<compile_context>
chip_gen: v7x
topology: tpu7x:2x2x1
jax: 0.10.0
libtpu: 0.0.40
codegen_flags: <defaults>
</compile_context>

<pallas_src>
import math
import jax
import jax.numpy as jnp
from jax import lax
from jax.experimental import pallas as pl
from jax.experimental.pallas import tpu as pltpu

# ----------------------------- config (small) -------------------------------
CONFIG = dict(
    window_size=8, n_features=4, hidden_dim=32, num_actions=4, num_atoms=8,
    v_min=-10.0, v_max=10.0, nhead=4, num_encoder_layers=2,
    dim_feedforward=64, transformer_dropout=0.0,
)
BATCH = 2
W = CONFIG["window_size"]
F = CONFIG["n_features"]
H = CONFIG["hidden_dim"]
A = CONFIG["num_actions"]
N = CONFIG["num_atoms"]
NHEAD = CONFIG["nhead"]
DH = H // NHEAD
DFF = CONFIG["dim_feedforward"]
NLAYERS = CONFIG["num_encoder_layers"]
ACC = H // 4
SHARED = H + ACC
HEAD_HID = H // 2
LN_EPS = 1e-5
BW = BATCH * W                      # batch flattened into sublanes
AN = A * N
QKV_ROWS = 2 * H + NHEAD * H        # Q rows | K rows | per-head (Wv@Wo) rows

_NT = (((1,), (1,)), ((), ()))      # contract last dims of both  (A @ B^T)
_TN = (((0,), (0,)), ((), ()))      # contract first dims of both (A^T @ B)

SLAB_COLS = 128                     # one lane tile


# --------------------------- slab layout (static) ----------------------------
def _build_layout():
    layout = {}
    row = [0]

    def add(name, nrows, ncols):
        assert ncols <= SLAB_COLS
        layout[name] = (row[0], nrows, ncols)
        row[0] += -(-nrows // 8) * 8        # pad each block to an 8-row boundary

    add("emb_w", F, H)
    add("emb_add", BW, H)                   # PE (tiled over batch) + emb bias
    add("amask", NHEAD * BW, BW)            # block-diag batch mask, stacked per head
    add("gsum", AN, AN)                     # per-action group-sum matrix
    for l in range(NLAYERS):
        add(f"wqkv{l}", QKV_ROWS, H)        # [Wq^T*scale ; Wk^T ; (Wv_h@Wo_h)^T ...]
        add(f"bqkv{l}", QKV_ROWS, 1)
        add(f"w1_{l}", H, DFF)
        add(f"w2_{l}", DFF, H)
        add(f"misc{l}", 7, DFF)             # bo,b1,b2,g1,be1,g2,be2 (row-packed)
    add("acc_w", 2, ACC)
    add("acc_b", 1, ACC)
    add("va1m_w", H, 2 * HEAD_HID)
    add("va1a_w", ACC, 2 * HEAD_HID)
    add("va1_b", 1, 2 * HEAD_HID)
    add("wq_comb", 2 * HEAD_HID, AN)
    add("bq_comb", 1, AN)
    return layout, row[0]


LAYOUT, SLAB_ROWS = _build_layout()
INP_ROWS = BW + BATCH                       # market rows, then account rows


# ------------------------------- fused kernel --------------------------------
def _fused_layer_norm(y, gamma, beta):
    # One XLU reduction for both moments: mean([y ; y*y]) along lanes.
    rows = y.shape[0]
    mom = jnp.mean(jnp.concatenate([y, y * y], axis=0), axis=-1, keepdims=True)
    mu = mom[:rows, :]
    var = mom[rows:, :] - mu * mu
    return (y - mu) * lax.rsqrt(var + LN_EPS) * gamma + beta


def rainbow_kernel(inp_ref, slab_ref, o_ref):
    """Entire RainbowNetwork forward fused into one kernel (one grid point)."""

    def get(name):
        r0, nr, nc = LAYOUT[name]
        return slab_ref[pl.ds(r0, nr), pl.ds(0, nc)]

    md = inp_ref[pl.ds(0, BW), :]                       # (BW, F)
    acct = inp_ref[pl.ds(BW, BATCH), pl.ds(0, 2)]       # (B, 2)

    # Embedding + bias + positional encoding; batch flattened: x is (BW, H).
    x = jnp.dot(md, get("emb_w"), preferred_element_type=jnp.float32) + get("emb_add")
    mask_s = get("amask")                               # (NHEAD*BW, BW), 0 / -1e30

    for l in range(NLAYERS):
        wqkv_t = get(f"wqkv{l}")                        # (QKV_ROWS, H)
        bqkv = get(f"bqkv{l}")                          # (QKV_ROWS, 1)
        w1 = get(f"w1_{l}")
        w2 = get(f"w2_{l}")
        r0 = LAYOUT[f"misc{l}"][0]
        bo = slab_ref[pl.ds(r0 + 0, 1), pl.ds(0, H)]
        b1 = slab_ref[pl.ds(r0 + 1, 1), pl.ds(0, DFF)]
        b2 = slab_ref[pl.ds(r0 + 2, 1), pl.ds(0, H)]
        g1 = slab_ref[pl.ds(r0 + 3, 1), pl.ds(0, H)]
        be1 = slab_ref[pl.ds(r0 + 4, 1), pl.ds(0, H)]
        g2 = slab_ref[pl.ds(r0 + 5, 1), pl.ds(0, H)]
        be2 = slab_ref[pl.ds(r0 + 6, 1), pl.ds(0, H)]

        # Fused Q | K | V·Wo projection, computed transposed (NT matmul, no
        # activation transpose): (QKV_ROWS, BW).  Attention scale is folded
        # into the Q rows; Wo is folded into the per-head V rows at pack time.
        qkv_t = lax.dot_general(wqkv_t, x, _NT,
                                preferred_element_type=jnp.float32) + bqkv

        # Per-head scores (axis-0 contraction: no transposes materialized),
        # stacked along sublanes and run through ONE merged softmax.
        s_list = []
        for h in range(NHEAD):                           # static unroll
            qt = qkv_t[h * DH:(h + 1) * DH, :]           # (DH, BW)
            kt = qkv_t[H + h * DH:H + (h + 1) * DH, :]   # (DH, BW)
            s_list.append(lax.dot_general(qt, kt, _TN,
                                          preferred_element_type=jnp.float32))
        s = jnp.concatenate(s_list, axis=0) + mask_s     # (NHEAD*BW, BW)
        s = s - jnp.max(s, axis=-1, keepdims=True)
        p = jnp.exp(s)
        p = p * pl.reciprocal(jnp.sum(p, axis=-1, keepdims=True), approx=True)

        attn = None
        for h in range(NHEAD):
            ph = p[h * BW:(h + 1) * BW, :]                           # (BW, BW)
            vot = qkv_t[2 * H + h * H:2 * H + (h + 1) * H, :]        # (H, BW)
            a_h = lax.dot_general(ph, vot, _NT,
                                  preferred_element_type=jnp.float32)  # (BW, H)
            attn = a_h if attn is None else attn + a_h
        attn = attn + bo

        x = _fused_layer_norm(x + attn, g1, be1)
        ff = jnp.maximum(
            jnp.dot(x, w1, preferred_element_type=jnp.float32) + b1, 0.0)
        ff = jnp.dot(ff, w2, preferred_element_type=jnp.float32) + b2
        x = _fused_layer_norm(x + ff, g2, be2)

    # Last-timestep selection: static sublane slices of the resident value.
    mkt = jnp.concatenate(
        [x[b * W + W - 1:b * W + W, :] for b in range(BATCH)], axis=0)   # (B, H)

    # Account MLP.
    af = jnp.maximum(
        jnp.dot(acct, get("acc_w"), preferred_element_type=jnp.float32)
        + get("acc_b"), 0.0)                                             # (B, ACC)

    # Fused value|advantage hidden layer (split weights instead of lane concat).
    hcat = jnp.maximum(
        jnp.dot(mkt, get("va1m_w"), preferred_element_type=jnp.float32)
        + jnp.dot(af, get("va1a_w"), preferred_element_type=jnp.float32)
        + get("va1_b"), 0.0)                                             # (B, 2*HEAD_HID)

    # Dueling combine (value + adv - mean_a adv) folded into wq_comb/bq_comb.
    q = jnp.dot(hcat, get("wq_comb"), preferred_element_type=jnp.float32) \
        + get("bq_comb")
    q = jnp.clip(q, -10000.0, 10000.0)                                   # (B, A*N)

    # Per-action log-softmax over atoms: exact for any per-row shift; group
    # sums broadcast back with one block-diagonal matmul. One dense store.
    m = jnp.max(q, axis=-1, keepdims=True)
    e = jnp.exp(q - m)
    gs = jnp.dot(e, get("gsum"), preferred_element_type=jnp.float32)
    o_ref[...] = q - m - jnp.log(gs)


# ----------------------------- pallas wrapper --------------------------------
def pack_params(p):
    """Fuse / pre-lay-out all weights into ONE f32 slab (pure JAX, done once)."""
    scale = 1.0 / math.sqrt(DH)
    slab = jnp.zeros((SLAB_ROWS, SLAB_COLS), jnp.float32)

    def put(s, name, arr):
        r0, nr, nc = LAYOUT[name]
        arr = jnp.asarray(arr, jnp.float32)
        assert arr.shape == (nr, nc), (name, arr.shape, (nr, nc))
        return s.at[r0:r0 + nr, 0:nc].set(arr)

    slab = put(slab, "emb_w", p["emb_w"])
    slab = put(slab, "emb_add", jnp.tile(p["pe"], (BATCH, 1)) + p["emb_b"])

    row_b = jnp.arange(BW, dtype=jnp.int32) // W
    amask1 = jnp.where(row_b[:, None] == row_b[None, :], 0.0, -1e30).astype(jnp.float32)
    slab = put(slab, "amask", jnp.tile(amask1, (NHEAD, 1)))

    grp = jnp.arange(AN, dtype=jnp.int32) // N
    slab = put(slab, "gsum", (grp[:, None] == grp[None, :]).astype(jnp.float32))

    for l, lp in enumerate(p["layers"]):
        wq, bq, wk, bk, wv, bv, wo, bo, g1, be1, w1, b1, w2, b2, g2, be2 = lp
        blocks = [(wq * scale).T, wk.T]                       # scale folded into Q
        bias_blocks = [(bq * scale).T, bk.T]
        for h in range(NHEAD):                                # fold Wo into Wv/bv
            wv_h = wv[:, h * DH:(h + 1) * DH]                 # (H, DH)
            wo_h = wo[h * DH:(h + 1) * DH, :]                 # (DH, H)
            bv_h = bv[:, h * DH:(h + 1) * DH]                 # (1, DH)
            blocks.append((wv_h @ wo_h).T)                    # (H, H)
            bias_blocks.append((bv_h @ wo_h).T)               # (H, 1)
        slab = put(slab, f"wqkv{l}", jnp.concatenate(blocks, axis=0))
        slab = put(slab, f"bqkv{l}", jnp.concatenate(bias_blocks, axis=0))
        slab = put(slab, f"w1_{l}", w1)
        slab = put(slab, f"w2_{l}", w2)
        misc = jnp.zeros((7, DFF), jnp.float32)
        misc = misc.at[0, :H].set(bo[0])
        misc = misc.at[1, :DFF].set(b1[0])
        misc = misc.at[2, :H].set(b2[0])
        misc = misc.at[3, :H].set(g1[0])
        misc = misc.at[4, :H].set(be1[0])
        misc = misc.at[5, :H].set(g2[0])
        misc = misc.at[6, :H].set(be2[0])
        slab = put(slab, f"misc{l}", misc)

    slab = put(slab, "acc_w", p["acc_w"])
    slab = put(slab, "acc_b", p["acc_b"])

    # Value / advantage stems fused; input split into (market, account) parts.
    slab = put(slab, "va1m_w",
               jnp.concatenate([p["v1_w"][:H], p["a1_w"][:H]], axis=1))
    slab = put(slab, "va1a_w",
               jnp.concatenate([p["v1_w"][H:], p["a1_w"][H:]], axis=1))
    slab = put(slab, "va1_b", jnp.concatenate([p["v1_b"], p["a1_b"]], axis=1))

    # Fold dueling combine into the final weights.
    a2w_mean = jnp.mean(p["a2_w"].reshape(HEAD_HID, A, N), axis=1)       # (HEAD_HID, N)
    a2b_mean = jnp.mean(p["a2_b"].reshape(1, A, N), axis=1)              # (1, N)
    wq_comb = jnp.concatenate(
        [jnp.tile(p["v2_w"], (1, A)), p["a2_w"] - jnp.tile(a2w_mean, (1, A))], axis=0)
    bq_comb = jnp.tile(p["v2_b"], (1, A)) + (p["a2_b"] - jnp.tile(a2b_mean, (1, A)))
    slab = put(slab, "wq_comb", wq_comb)
    slab = put(slab, "bq_comb", bq_comb)
    return slab


def _pack_inputs(market_data, account_state):
    inp = jnp.zeros((INP_ROWS, F), jnp.float32)
    inp = inp.at[:BW, :].set(market_data.reshape(BW, F))
    inp = inp.at[BW:, :2].set(account_state)
    return inp


@jax.jit
def rainbow_forward(slab, market_data, account_state):
    inp = _pack_inputs(market_data, account_state)
    out = pl.pallas_call(
        rainbow_kernel,
        out_shape=jax.ShapeDtypeStruct((BATCH, AN), jnp.float32),
        grid=(1,),
        in_specs=[pl.BlockSpec((INP_ROWS, F), lambda i: (0, 0)),
                  pl.BlockSpec((SLAB_ROWS, SLAB_COLS), lambda i: (0, 0))],
        out_specs=pl.BlockSpec((BATCH, AN), lambda i: (0, 0)),
        compiler_params=pltpu.CompilerParams(dimension_semantics=("arbitrary",)),
    )(inp, slab)
    return out.reshape(BATCH, A, N)


# ------------------------- parameter construction ----------------------------
def positional_encoding(max_len, d_model):
    position = jnp.arange(max_len, dtype=jnp.float32)[:, None]
    div_term = jnp.exp(jnp.arange(0, d_model, 2, dtype=jnp.float32)
                       * (-math.log(10000.0) / d_model))
    pe = jnp.zeros((max_len, d_model), jnp.float32)
    pe = pe.at[:, 0::2].set(jnp.sin(position * div_term))
    pe = pe.at[:, 1::2].set(jnp.cos(position * div_term))   # d_model is even
    return pe


def scale_noise(key, size):
    x = jax.random.normal(key, (size,), jnp.float32)
    return jnp.sign(x) * jnp.sqrt(jnp.abs(x))


def linear_params(key, in_f, out_f):
    # kaiming_normal_(fan_in, relu): std = sqrt(2/fan_in), zero bias.
    w = jax.random.normal(key, (in_f, out_f), jnp.float32) * math.sqrt(2.0 / in_f)
    return w, jnp.zeros((1, out_f), jnp.float32)


def noisy_linear_params(key, in_f, out_f, std_init=0.5):
    k1, k2, k3, k4 = jax.random.split(key, 4)
    mu_range = 1.0 / math.sqrt(in_f)
    w_mu = jax.random.uniform(k1, (out_f, in_f), jnp.float32, -mu_range, mu_range)
    w_sigma = jnp.full((out_f, in_f), std_init / math.sqrt(in_f), jnp.float32)
    b_mu = jax.random.uniform(k2, (out_f,), jnp.float32, -mu_range, mu_range)
    b_sigma = jnp.full((out_f,), std_init / math.sqrt(out_f), jnp.float32)
    eps_in = scale_noise(k3, in_f)
    eps_out = scale_noise(k4, out_f)
    w = w_mu + w_sigma * (eps_out[:, None] * eps_in[None, :])
    b = b_mu + b_sigma * eps_out
    return w.T, b.reshape(1, out_f)


def init_params(key):
    keys = jax.random.split(key, 8 + NLAYERS)
    p = {}
    p["emb_w"], p["emb_b"] = linear_params(keys[0], F, H)
    p["pe"] = positional_encoding(W, H)

    layers = []
    for l in range(NLAYERS):
        lk = jax.random.split(keys[1 + l], 6)

        def lw(k, i, o):
            return jax.random.normal(k, (i, o), jnp.float32) * (1.0 / math.sqrt(i))

        zH = jnp.zeros((1, H), jnp.float32)
        onesH = jnp.ones((1, H), jnp.float32)
        wq, wk, wv, wo = lw(lk[0], H, H), lw(lk[1], H, H), lw(lk[2], H, H), lw(lk[3], H, H)
        w1, b1 = lw(lk[4], H, DFF), jnp.zeros((1, DFF), jnp.float32)
        w2, b2 = lw(lk[5], DFF, H), zH
        layers.append((wq, zH, wk, zH, wv, zH, wo, zH,
                       onesH, zH, w1, b1, w2, b2, onesH, zH))
    p["layers"] = layers

    idx = 1 + NLAYERS
    p["acc_w"], p["acc_b"] = linear_params(keys[idx], 2, ACC); idx += 1
    p["v1_w"], p["v1_b"] = noisy_linear_params(keys[idx], SHARED, HEAD_HID); idx += 1
    p["v2_w"], p["v2_b"] = noisy_linear_params(keys[idx], HEAD_HID, N); idx += 1
    p["a1_w"], p["a1_b"] = noisy_linear_params(keys[idx], SHARED, HEAD_HID); idx += 1
    p["a2_w"], p["a2_b"] = noisy_linear_params(keys[idx], HEAD_HID, A * N); idx += 1
    return p


# ----------------------------- pure-JAX reference ----------------------------
def reference_forward(p, market_data, account_state):
    x = market_data @ p["emb_w"] + p["emb_b"] + p["pe"][None]
    for lp in p["layers"]:
        wq, bq, wk, bk, wv, bv, wo, bo, g1, be1, w1, b1, w2, b2, g2, be2 = lp
        q = x @ wq + bq
        k = x @ wk + bk
        v = x @ wv + bv
        qh = q.reshape(BATCH, W, NHEAD, DH).transpose(0, 2, 1, 3)
        kh = k.reshape(BATCH, W, NHEAD, DH).transpose(0, 2, 1, 3)
        vh = v.reshape(BATCH, W, NHEAD, DH).transpose(0, 2, 1, 3)
        s = jnp.einsum("bhqd,bhkd->bhqk", qh, kh) / math.sqrt(DH)
        attn = jnp.einsum("bhqk,bhkd->bhqd", jax.nn.softmax(s, axis=-1), vh)
        attn = attn.transpose(0, 2, 1, 3).reshape(BATCH, W, H) @ wo + bo

        def ln(y, g, b_):
            mu = y.mean(-1, keepdims=True)
            var = ((y - mu) ** 2).mean(-1, keepdims=True)
            return (y - mu) / jnp.sqrt(var + LN_EPS) * g + b_

        x = ln(x + attn, g1, be1)
        ff = jnp.maximum(x @ w1 + b1, 0.0) @ w2 + b2
        x = ln(x + ff, g2, be2)

    mkt = x[:, -1, :]
    af = jnp.maximum(account_state @ p["acc_w"] + p["acc_b"], 0.0)
    shared = jnp.concatenate([mkt, af], axis=-1)
    value = jnp.maximum(shared @ p["v1_w"] + p["v1_b"], 0.0) @ p["v2_w"] + p["v2_b"]
    adv = jnp.maximum(shared @ p["a1_w"] + p["a1_b"], 0.0) @ p["a2_w"] + p["a2_b"]
    qlog = value[:, None, :] + adv.reshape(BATCH, A, N) \
        - adv.reshape(BATCH, A, N).mean(axis=1, keepdims=True)
    qlog = jnp.clip(qlog, -10000.0, 10000.0)
    return jax.nn.log_softmax(qlog, axis=2)


# ---------------------------------- main -------------------------------------
if __name__ == "__main__":
    key = jax.random.PRNGKey(0)
    k_md, k_acc, k_params = jax.random.split(key, 3)
    market_data = jax.random.normal(k_md, (BATCH, W, F), jnp.float32)
    account_state = jax.random.normal(k_acc, (BATCH, 2), jnp.float32)
    params = init_params(k_params)
    slab = pack_params(params)

    log_probs = rainbow_forward(slab, market_data, account_state)
    log_probs = jax.block_until_ready(log_probs)

    assert log_probs.shape == (BATCH, A, N), log_probs.shape
    assert bool(jnp.all(jnp.isfinite(log_probs)))
    # probabilities over atoms sum to 1
    psum = jnp.sum(jnp.exp(log_probs), axis=-1)
    assert bool(jnp.allclose(psum, 1.0, atol=1e-4))
    # check against pure-JAX reference
    ref = reference_forward(params, market_data, account_state)
    assert bool(jnp.allclose(log_probs, ref, atol=1e-2, rtol=1e-2))

    print("KERNEL_OK")
</pallas_src>

<mosaic_0001>
module attributes {stable_mosaic.version = 11 : i64} {
  func.func @rainbow_kernel(%arg0: i32, %arg1: memref<18x4xf32, #tpu.memory_space<vmem>>, %arg2: memref<1200x128xf32, #tpu.memory_space<vmem>>, %arg3: memref<2x32xf32, #tpu.memory_space<vmem>>) attributes {dimension_semantics = [#tpu.dimension_semantics<arbitrary>], iteration_bounds = array<i64: 1>, scalar_prefetch = 0 : i64, scratch_operands = 0 : i64, tpu.core_type = #tpu.core_type<tc>, window_params = [{pipeline_mode = #tpu.pipeline_mode<synchronous>, transform_indices = @transform_0, window_bounds = array<i64: 18, 4>}, {pipeline_mode = #tpu.pipeline_mode<synchronous>, transform_indices = @transform_1, window_bounds = array<i64: 1200, 128>}, {pipeline_mode = #tpu.pipeline_mode<synchronous>, transform_indices = @transform_2, window_bounds = array<i64: 2, 32>}]} {
    %c0 = arith.constant 0 : index
    %c0_0 = arith.constant 0 : index
    %0 = vector.load %arg1[%c0, %c0_0] : memref<18x4xf32, #tpu.memory_space<vmem>>, vector<16x4xf32>
    %c16 = arith.constant 16 : index
    %c0_1 = arith.constant 0 : index
    %1 = vector.load %arg1[%c16, %c0_1] : memref<18x4xf32, #tpu.memory_space<vmem>>, vector<2x2xf32>
    %c0_2 = arith.constant 0 : index
    %c0_3 = arith.constant 0 : index
    %2 = vector.load %arg2[%c0_2, %c0_3] : memref<1200x128xf32, #tpu.memory_space<vmem>>, vector<4x32xf32>
    %cst = arith.constant dense<0.000000e+00> : vector<16x32xf32>
    %3 = tpu.matmul %0, %2, %cst {dimension_numbers = #tpu.dot_dimension_numbers<[1], [0], [0], [1], [0, 0, 1, 1], [], []>} : vector<16x4xf32>, vector<4x32xf32>, vector<16x32xf32> -> vector<16x32xf32>
    %c8 = arith.constant 8 : index
    %c0_4 = arith.constant 0 : index
    %4 = vector.load %arg2[%c8, %c0_4] : memref<1200x128xf32, #tpu.memory_space<vmem>>, vector<16x32xf32>
    %5 = arith.addf %3, %4 : vector<16x32xf32>
    %c24 = arith.constant 24 : index
    %c0_5 = arith.constant 0 : index
    %6 = vector.load %arg2[%c24, %c0_5] : memref<1200x128xf32, #tpu.memory_space<vmem>>, vector<64x16xf32>
    %c120 = arith.constant 120 : index
    %c0_6 = arith.constant 0 : index
    %7 = vector.load %arg2[%c120, %c0_6] : memref<1200x128xf32, #tpu.memory_space<vmem>>, vector<192x32xf32>
    %c312 = arith.constant 312 : index
    %c0_7 = arith.constant 0 : index
    %8 = vector.load %arg2[%c312, %c0_7] : memref<1200x128xf32, #tpu.memory_space<vmem>>, vector<192x1xf32>
    %c504 = arith.constant 504 : index
    %c0_8 = arith.constant 0 : index
    %9 = vector.load %arg2[%c504, %c0_8] : memref<1200x128xf32, #tpu.memory_space<vmem>>, vector<32x64xf32>
    %c536 = arith.constant 536 : index
    %c0_9 = arith.constant 0 : index
    %10 = vector.load %arg2[%c536, %c0_9] : memref<1200x128xf32, #tpu.memory_space<vmem>>, vector<64x32xf32>
    %c600 = arith.constant 600 : index
    %c0_10 = arith.constant 0 : index
    %11 = vector.load %arg2[%c600, %c0_10] : memref<1200x128xf32, #tpu.memory_space<vmem>>, vector<1x32xf32>
    %c601 = arith.constant 601 : index
    %c0_11 = arith.constant 0 : index
    %12 = vector.load %arg2[%c601, %c0_11] : memref<1200x128xf32, #tpu.memory_space<vmem>>, vector<1x64xf32>
    %c602 = arith.constant 602 : index
    %c0_12 = arith.constant 0 : index
    %13 = vector.load %arg2[%c602, %c0_12] : memref<1200x128xf32, #tpu.memory_space<vmem>>, vector<1x32xf32>
    %c603 = arith.constant 603 : index
    %c0_13 = arith.constant 0 : index
    %14 = vector.load %arg2[%c603, %c0_13] : memref<1200x128xf32, #tpu.memory_space<vmem>>, vector<1x32xf32>
    %c604 = arith.constant 604 : index
    %c0_14 = arith.constant 0 : index
    %15 = vector.load %arg2[%c604, %c0_14] : memref<1200x128xf32, #tpu.memory_space<vmem>>, vector<1x32xf32>
    %c605 = arith.constant 605 : index
    %c0_15 = arith.constant 0 : index
    %16 = vector.load %arg2[%c605, %c0_15] : memref<1200x128xf32, #tpu.memory_space<vmem>>, vector<1x32xf32>
    %c606 = arith.constant 606 : index
    %c0_16 = arith.constant 0 : index
    %17 = vector.load %arg2[%c606, %c0_16] : memref<1200x128xf32, #tpu.memory_space<vmem>>, vector<1x32xf32>
    %cst_17 = arith.constant dense<0.000000e+00> : vector<192x16xf32>
    %18 = tpu.matmul %7, %5, %cst_17 {dimension_numbers = #tpu.dot_dimension_numbers<[1], [1], [0], [0], [0, 0, 1, 0], [], []>} : vector<192x32xf32>, vector<16x32xf32>, vector<192x16xf32> -> vector<192x16xf32>
    %19 = vector.broadcast %8 : vector<192x1xf32> to vector<192x16xf32>
    %20 = arith.addf %18, %19 : vector<192x16xf32>
    %21 = vector.extract_strided_slice %20 {offsets = [0, 0], sizes = [8, 16], strides = [1, 1]} : vector<192x16xf32> to vector<8x16xf32>
    %22 = vector.extract_strided_slice %20 {offsets = [32, 0], sizes = [8, 16], strides = [1, 1]} : vector<192x16xf32> to vector<8x16xf32>
    %cst_18 = arith.constant dense<0.000000e+00> : vector<16x16xf32>
    %23 = tpu.matmul %21, %22, %cst_18 {dimension_numbers = #tpu.dot_dimension_numbers<[0], [0], [1], [1], [0, 1, 1, 1], [], []>} : vector<8x16xf32>, vector<8x16xf32>, vector<16x16xf32> -> vector<16x16xf32>
    %24 = vector.extract_strided_slice %20 {offsets = [8, 0], sizes = [8, 16], strides = [1, 1]} : vector<192x16xf32> to vector<8x16xf32>
    %25 = vector.extract_strided_slice %20 {offsets = [40, 0], sizes = [8, 16], strides = [1, 1]} : vector<192x16xf32> to vector<8x16xf32>
    %cst_19 = arith.constant dense<0.000000e+00> : vector<16x16xf32>
    %26 = tpu.matmul %24, %25, %cst_19 {dimension_numbers = #tpu.dot_dimension_numbers<[0], [0], [1], [1], [0, 1, 1, 1], [], []>} : vector<8x16xf32>, vector<8x16xf32>, vector<16x16xf32> -> vector<16x16xf32>
    %27 = vector.extract_strided_slice %20 {offsets = [16, 0], sizes = [8, 16], strides = [1, 1]} : vector<192x16xf32> to vector<8x16xf32>
    %28 = vector.extract_strided_slice %20 {offsets = [48, 0], sizes = [8, 16], strides = [1, 1]} : vector<192x16xf32> to vector<8x16xf32>
    %cst_20 = arith.constant dense<0.000000e+00> : vector<16x16xf32>
    %29 = tpu.matmul %27, %28, %cst_20 {dimension_numbers = #tpu.dot_dimension_numbers<[0], [0], [1], [1], [0, 1, 1, 1], [], []>} : vector<8x16xf32>, vector<8x16xf32>, vector<16x16xf32> -> vector<16x16xf32>
    %30 = vector.extract_strided_slice %20 {offsets = [24, 0], sizes = [8, 16], strides = [1, 1]} : vector<192x16xf32> to vector<8x16xf32>
    %31 = vector.extract_strided_slice %20 {offsets = [56, 0], sizes = [8, 16], strides = [1, 1]} : vector<192x16xf32> to vector<8x16xf32>
    %cst_21 = arith.constant dense<0.000000e+00> : vector<16x16xf32>
    %32 = tpu.matmul %30, %31, %cst_21 {dimension_numbers = #tpu.dot_dimension_numbers<[0], [0], [1], [1], [0, 1, 1, 1], [], []>} : vector<8x16xf32>, vector<8x16xf32>, vector<16x16xf32> -> vector<16x16xf32>
    %33 = tpu.concatenate %23, %26, %29, %32 in 0 : vector<16x16xf32>, vector<16x16xf32>, vector<16x16xf32>, vector<16x16xf32> -> vector<64x16xf32>
    %34 = arith.addf %33, %6 : vector<64x16xf32>
    %cst_22 = arith.constant dense<0xFF800000> : vector<64xf32>
    %35 = vector.multi_reduction <maximumf>, %34, %cst_22 [1] : vector<64x16xf32> to vector<64xf32>
    %36 = vector.shape_cast %35 : vector<64xf32> to vector<64x1xf32>
    %37 = vector.broadcast %36 : vector<64x1xf32> to vector<64x16xf32>
    %38 = arith.subf %34, %37 : vector<64x16xf32>
    %39 = math.exp %38 : vector<64x16xf32>
    %cst_23 = arith.constant dense<0.000000e+00> : vector<64xf32>
    %40 = vector.multi_reduction <add>, %39, %cst_23 [1] : vector<64x16xf32> to vector<64xf32>
    %41 = vector.shape_cast %40 : vector<64xf32> to vector<64x1xf32>
    %42 = tpu.reciprocal %41 {approx = true} : vector<64x1xf32> -> vector<64x1xf32>
    %43 = vector.broadcast %42 : vector<64x1xf32> to vector<64x16xf32>
    %44 = arith.mulf %39, %43 : vector<64x16xf32>
    %45 = vector.extract_strided_slice %44 {offsets = [0, 0], sizes = [16, 16], strides = [1, 1]} : vector<64x16xf32> to vector<16x16xf32>
    %46 = vector.extract_strided_slice %20 {offsets = [64, 0], sizes = [32, 16], strides = [1, 1]} : vector<192x16xf32> to vector<32x16xf32>
    %cst_24 = arith.constant dense<0.000000e+00> : vector<16x32xf32>
    %47 = tpu.matmul %45, %46, %cst_24 {dimension_numbers = #tpu.dot_dimension_numbers<[1], [1], [0], [0], [0, 0, 1, 0], [], []>} : vector<16x16xf32>, vector<32x16xf32>, vector<16x32xf32> -> vector<16x32xf32>
    %48 = vector.extract_strided_slice %44 {offsets = [16, 0], sizes = [16, 16], strides = [1, 1]} : vector<64x16xf32> to vector<16x16xf32>
    %49 = vector.extract_strided_slice %20 {offsets = [96, 0], sizes = [32, 16], strides = [1, 1]} : vector<192x16xf32> to vector<32x16xf32>
    %cst_25 = arith.constant dense<0.000000e+00> : vector<16x32xf32>
    %50 = tpu.matmul %48, %49, %cst_25 {dimension_numbers = #tpu.dot_dimension_numbers<[1], [1], [0], [0], [0, 0, 1, 0], [], []>} : vector<16x16xf32>, vector<32x16xf32>, vector<16x32xf32> -> vector<16x32xf32>
    %51 = arith.addf %47, %50 : vector<16x32xf32>
    %52 = vector.extract_strided_slice %44 {offsets = [32, 0], sizes = [16, 16], strides = [1, 1]} : vector<64x16xf32> to vector<16x16xf32>
    %53 = vector.extract_strided_slice %20 {offsets = [128, 0], sizes = [32, 16], strides = [1, 1]} : vector<192x16xf32> to vector<32x16xf32>
    %cst_26 = arith.constant dense<0.000000e+00> : vector<16x32xf32>
    %54 = tpu.matmul %52, %53, %cst_26 {dimension_numbers = #tpu.dot_dimension_numbers<[1], [1], [0], [0], [0, 0, 1, 0], [], []>} : vector<16x16xf32>, vector<32x16xf32>, vector<16x32xf32> -> vector<16x32xf32>
    %55 = arith.addf %51, %54 : vector<16x32xf32>
    %56 = vector.extract_strided_slice %44 {offsets = [48, 0], sizes = [16, 16], strides = [1, 1]} : vector<64x16xf32> to vector<16x16xf32>
    %57 = vector.extract_strided_slice %20 {offsets = [160, 0], sizes = [32, 16], strides = [1, 1]} : vector<192x16xf32> to vector<32x16xf32>
    %cst_27 = arith.constant dense<0.000000e+00> : vector<16x32xf32>
    %58 = tpu.matmul %56, %57, %cst_27 {dimension_numbers = #tpu.dot_dimension_numbers<[1], [1], [0], [0], [0, 0, 1, 0], [], []>} : vector<16x16xf32>, vector<32x16xf32>, vector<16x32xf32> -> vector<16x32xf32>
    %59 = arith.addf %55, %58 : vector<16x32xf32>
    %60 = vector.broadcast %11 : vector<1x32xf32> to vector<16x32xf32>
    %61 = arith.addf %59, %60 : vector<16x32xf32>
    %62 = arith.addf %5, %61 : vector<16x32xf32>
    %63 = arith.mulf %62, %62 : vector<16x32xf32>
    %64 = tpu.concatenate %62, %63 in 0 : vector<16x32xf32>, vector<16x32xf32> -> vector<32x32xf32>
    %cst_28 = arith.constant dense<0.000000e+00> : vector<32xf32>
    %65 = vector.multi_reduction <add>, %64, %cst_28 [1] : vector<32x32xf32> to vector<32xf32>
    %66 = vector.shape_cast %65 : vector<32xf32> to vector<32x1xf32>
    %cst_29 = arith.constant 3.200000e+01 : f32
    %67 = vector.broadcast %cst_29 : f32 to vector<32x1xf32>
    %68 = arith.divf %66, %67 : vector<32x1xf32>
    %69 = vector.extract_strided_slice %68 {offsets = [0, 0], sizes = [16, 1], strides = [1, 1]} : vector<32x1xf32> to vector<16x1xf32>
    %70 = vector.extract_strided_slice %68 {offsets = [16, 0], sizes = [16, 1], strides = [1, 1]} : vector<32x1xf32> to vector<16x1xf32>
    %71 = arith.mulf %69, %69 : vector<16x1xf32>
    %72 = arith.subf %70, %71 : vector<16x1xf32>
    %73 = vector.broadcast %69 : vector<16x1xf32> to vector<16x32xf32>
    %74 = arith.subf %62, %73 : vector<16x32xf32>
    %cst_30 = arith.constant 9.99999974E-6 : f32
    %75 = vector.broadcast %cst_30 : f32 to vector<16x1xf32>
    %76 = arith.addf %72, %75 : vector<16x1xf32>
    %77 = math.rsqrt %76 : vector<16x1xf32>
    %78 = vector.broadcast %77 : vector<16x1xf32> to vector<16x32xf32>
    %79 = arith.mulf %74, %78 : vector<16x32xf32>
    %80 = vector.broadcast %14 : vector<1x32xf32> to vector<16x32xf32>
    %81 = arith.mulf %79, %80 : vector<16x32xf32>
    %82 = vector.broadcast %15 : vector<1x32xf32> to vector<16x32xf32>
    %83 = arith.addf %81, %82 : vector<16x32xf32>
    %cst_31 = arith.constant dense<0.000000e+00> : vector<16x64xf32>
    %84 = tpu.matmul %83, %9, %cst_31 {dimension_numbers = #tpu.dot_dimension_numbers<[1], [0], [0], [1], [0, 0, 1, 1], [], []>} : vector<16x32xf32>, vector<32x64xf32>, vector<16x64xf32> -> vector<16x64xf32>
    %85 = vector.broadcast %12 : vector<1x64xf32> to vector<16x64xf32>
    %86 = arith.addf %84, %85 : vector<16x64xf32>
    %cst_32 = arith.constant 0.000000e+00 : f32
    %87 = vector.broadcast %cst_32 : f32 to vector<16x64xf32>
    %88 = arith.maximumf %86, %87 : vector<16x64xf32>
    %cst_33 = arith.constant dense<0.000000e+00> : vector<16x32xf32>
    %89 = tpu.matmul %88, %10, %cst_33 {dimension_numbers = #tpu.dot_dimension_numbers<[1], [0], [0], [1], [0, 0, 1, 1], [], []>} : vector<16x64xf32>, vector<64x32xf32>, vector<16x32xf32> -> vector<16x32xf32>
    %90 = vector.broadcast %13 : vector<1x32xf32> to vector<16x32xf32>
    %91 = arith.addf %89, %90 : vector<16x32xf32>
    %92 = arith.addf %83, %91 : vector<16x32xf32>
    %93 = arith.mulf %92, %92 : vector<16x32xf32>
    %94 = tpu.concatenate %92, %93 in 0 : vector<16x32xf32>, vector<16x32xf32> -> vector<32x32xf32>
    %cst_34 = arith.constant dense<0.000000e+00> : vector<32xf32>
    %95 = vector.multi_reduction <add>, %94, %cst_34 [1] : vector<32x32xf32> to vector<32xf32>
    %96 = vector.shape_cast %95 : vector<32xf32> to vector<32x1xf32>
    %cst_35 = arith.constant 3.200000e+01 : f32
    %97 = vector.broadcast %cst_35 : f32 to vector<32x1xf32>
    %98 = arith.divf %96, %97 : vector<32x1xf32>
    %99 = vector.extract_strided_slice %98 {offsets = [0, 0], sizes = [16, 1], strides = [1, 1]} : vector<32x1xf32> to vector<16x1xf32>
    %100 = vector.extract_strided_slice %98 {offsets = [16, 0], sizes = [16, 1], strides = [1, 1]} : vector<32x1xf32> to vector<16x1xf32>
    %101 = arith.mulf %99, %99 : vector<16x1xf32>
    %102 = arith.subf %100, %101 : vector<16x1xf32>
    %103 = vector.broadcast %99 : vector<16x1xf32> to vector<16x32xf32>
    %104 = arith.subf %92, %103 : vector<16x32xf32>
    %cst_36 = arith.constant 9.99999974E-6 : f32
    %105 = vector.broadcast %cst_36 : f32 to vector<16x1xf32>
    %106 = arith.addf %102, %105 : vector<16x1xf32>
    %107 = math.rsqrt %106 : vector<16x1xf32>
    %108 = vector.broadcast %107 : vector<16x1xf32> to vector<16x32xf32>
    %109 = arith.mulf %104, %108 : vector<16x32xf32>
    %110 = vector.broadcast %16 : vector<1x32xf32> to vector<16x32xf32>
    %111 = arith.mulf %109, %110 : vector<16x32xf32>
    %112 = vector.broadcast %17 : vector<1x32xf32> to vector<16x32xf32>
    %113 = arith.addf %111, %112 : vector<16x32xf32>
    %c608 = arith.constant 608 : index
    %c0_37 = arith.constant 0 : index
    %114 = vector.load %arg2[%c608, %c0_37] : memref<1200x128xf32, #tpu.memory_space<vmem>>, vector<192x32xf32>
    %c800 = arith.constant 800 : index
    %c0_38 = arith.constant 0 : index
    %115 = vector.load %arg2[%c800, %c0_38] : memref<1200x128xf32, #tpu.memory_space<vmem>>, vector<192x1xf32>
    %c992 = arith.constant 992 : index
    %c0_39 = arith.constant 0 : index
    %116 = vector.load %arg2[%c992, %c0_39] : memref<1200x128xf32, #tpu.memory_space<vmem>>, vector<32x64xf32>
    %c1024 = arith.constant 1024 : index
    %c0_40 = arith.constant 0 : index
    %117 = vector.load %arg2[%c1024, %c0_40] : memref<1200x128xf32, #tpu.memory_space<vmem>>, vector<64x32xf32>
    %c1088 = arith.constant 1088 : index
    %c0_41 = arith.constant 0 : index
    %118 = vector.load %arg2[%c1088, %c0_41] : memref<1200x128xf32, #tpu.memory_space<vmem>>, vector<1x32xf32>
    %c1089 = arith.constant 1089 : index
    %c0_42 = arith.constant 0 : index
    %119 = vector.load %arg2[%c1089, %c0_42] : memref<1200x128xf32, #tpu.memory_space<vmem>>, vector<1x64xf32>
    %c1090 = arith.constant 1090 : index
    %c0_43 = arith.constant 0 : index
    %120 = vector.load %arg2[%c1090, %c0_43] : memref<1200x128xf32, #tpu.memory_space<vmem>>, vector<1x32xf32>
    %c1091 = arith.constant 1091 : index
    %c0_44 = arith.constant 0 : index
    %121 = vector.load %arg2[%c1091, %c0_44] : memref<1200x128xf32, #tpu.memory_space<vmem>>, vector<1x32xf32>
    %c1092 = arith.constant 1092 : index
    %c0_45 = arith.constant 0 : index
    %122 = vector.load %arg2[%c1092, %c0_45] : memref<1200x128xf32, #tpu.memory_space<vmem>>, vector<1x32xf32>
    %c1093 = arith.constant 1093 : index
    %c0_46 = arith.constant 0 : index
    %123 = vector.load %arg2[%c1093, %c0_46] : memref<1200x128xf32, #tpu.memory_space<vmem>>, vector<1x32xf32>
    %c1094 = arith.constant 1094 : index
    %c0_47 = arith.constant 0 : index
    %124 = vector.load %arg2[%c1094, %c0_47] : memref<1200x128xf32, #tpu.memory_space<vmem>>, vector<1x32xf32>
    %cst_48 = arith.constant dense<0.000000e+00> : vector<192x16xf32>
    %125 = tpu.matmul %114, %113, %cst_48 {dimension_numbers = #tpu.dot_dimension_numbers<[1], [1], [0], [0], [0, 0, 1, 0], [], []>} : vector<192x32xf32>, vector<16x32xf32>, vector<192x16xf32> -> vector<192x16xf32>
    %126 = vector.broadcast %115 : vector<192x1xf32> to vector<192x16xf32>
    %127 = arith.addf %125, %126 : vector<192x16xf32>
    %128 = vector.extract_strided_slice %127 {offsets = [0, 0], sizes = [8, 16], strides = [1, 1]} : vector<192x16xf32> to vector<8x16xf32>
    %129 = vector.extract_strided_slice %127 {offsets = [32, 0], sizes = [8, 16], strides = [1, 1]} : vector<192x16xf32> to vector<8x16xf32>
    %cst_49 = arith.constant dense<0.000000e+00> : vector<16x16xf32>
    %130 = tpu.matmul %128, %129, %cst_49 {dimension_numbers = #tpu.dot_dimension_numbers<[0], [0], [1], [1], [0, 1, 1, 1], [], []>} : vector<8x16xf32>, vector<8x16xf32>, vector<16x16xf32> -> vector<16x16xf32>
    %131 = vector.extract_strided_slice %127 {offsets = [8, 0], sizes = [8, 16], strides = [1, 1]} : vector<192x16xf32> to vector<8x16xf32>
    %132 = vector.extract_strided_slice %127 {offsets = [40, 0], sizes = [8, 16], strides = [1, 1]} : vector<192x16xf32> to vector<8x16xf32>
    %cst_50 = arith.constant dense<0.000000e+00> : vector<16x16xf32>
    %133 = tpu.matmul %131, %132, %cst_50 {dimension_numbers = #tpu.dot_dimension_numbers<[0], [0], [1], [1], [0, 1, 1, 1], [], []>} : vector<8x16xf32>, vector<8x16xf32>, vector<16x16xf32> -> vector<16x16xf32>
    %134 = vector.extract_strided_slice %127 {offsets = [16, 0], sizes = [8, 16], strides = [1, 1]} : vector<192x16xf32> to vector<8x16xf32>
    %135 = vector.extract_strided_slice %127 {offsets = [48, 0], sizes = [8, 16], strides = [1, 1]} : vector<192x16xf32> to vector<8x16xf32>
    %cst_51 = arith.constant dense<0.000000e+00> : vector<16x16xf32>
    %136 = tpu.matmul %134, %135, %cst_51 {dimension_numbers = #tpu.dot_dimension_numbers<[0], [0], [1], [1], [0, 1, 1, 1], [], []>} : vector<8x16xf32>, vector<8x16xf32>, vector<16x16xf32> -> vector<16x16xf32>
    %137 = vector.extract_strided_slice %127 {offsets = [24, 0], sizes = [8, 16], strides = [1, 1]} : vector<192x16xf32> to vector<8x16xf32>
    %138 = vector.extract_strided_slice %127 {offsets = [56, 0], sizes = [8, 16], strides = [1, 1]} : vector<192x16xf32> to vector<8x16xf32>
    %cst_52 = arith.constant dense<0.000000e+00> : vector<16x16xf32>
    %139 = tpu.matmul %137, %138, %cst_52 {dimension_numbers = #tpu.dot_dimension_numbers<[0], [0], [1], [1], [0, 1, 1, 1], [], []>} : vector<8x16xf32>, vector<8x16xf32>, vector<16x16xf32> -> vector<16x16xf32>
    %140 = tpu.concatenate %130, %133, %136, %139 in 0 : vector<16x16xf32>, vector<16x16xf32>, vector<16x16xf32>, vector<16x16xf32> -> vector<64x16xf32>
    %141 = arith.addf %140, %6 : vector<64x16xf32>
    %cst_53 = arith.constant dense<0xFF800000> : vector<64xf32>
    %142 = vector.multi_reduction <maximumf>, %141, %cst_53 [1] : vector<64x16xf32> to vector<64xf32>
    %143 = vector.shape_cast %142 : vector<64xf32> to vector<64x1xf32>
    %144 = vector.broadcast %143 : vector<64x1xf32> to vector<64x16xf32>
    %145 = arith.subf %141, %144 : vector<64x16xf32>
    %146 = math.exp %145 : vector<64x16xf32>
    %cst_54 = arith.constant dense<0.000000e+00> : vector<64xf32>
    %147 = vector.multi_reduction <add>, %146, %cst_54 [1] : vector<64x16xf32> to vector<64xf32>
    %148 = vector.shape_cast %147 : vector<64xf32> to vector<64x1xf32>
    %149 = tpu.reciprocal %148 {approx = true} : vector<64x1xf32> -> vector<64x1xf32>
    %150 = vector.broadcast %149 : vector<64x1xf32> to vector<64x16xf32>
    %151 = arith.mulf %146, %150 : vector<64x16xf32>
    %152 = vector.extract_strided_slice %151 {offsets = [0, 0], sizes = [16, 16], strides = [1, 1]} : vector<64x16xf32> to vector<16x16xf32>
    %153 = vector.extract_strided_slice %127 {offsets = [64, 0], sizes = [32, 16], strides = [1, 1]} : vector<192x16xf32> to vector<32x16xf32>
    %cst_55 = arith.constant dense<0.000000e+00> : vector<16x32xf32>
    %154 = tpu.matmul %152, %153, %cst_55 {dimension_numbers = #tpu.dot_dimension_numbers<[1], [1], [0], [0], [0, 0, 1, 0], [], []>} : vector<16x16xf32>, vector<32x16xf32>, vector<16x32xf32> -> vector<16x32xf32>
    %155 = vector.extract_strided_slice %151 {offsets = [16, 0], sizes = [16, 16], strides = [1, 1]} : vector<64x16xf32> to vector<16x16xf32>
    %156 = vector.extract_strided_slice %127 {offsets = [96, 0], sizes = [32, 16], strides = [1, 1]} : vector<192x16xf32> to vector<32x16xf32>
    %cst_56 = arith.constant dense<0.000000e+00> : vector<16x32xf32>
    %157 = tpu.matmul %155, %156, %cst_56 {dimension_numbers = #tpu.dot_dimension_numbers<[1], [1], [0], [0], [0, 0, 1, 0], [], []>} : vector<16x16xf32>, vector<32x16xf32>, vector<16x32xf32> -> vector<16x32xf32>
    %158 = arith.addf %154, %157 : vector<16x32xf32>
    %159 = vector.extract_strided_slice %151 {offsets = [32, 0], sizes = [16, 16], strides = [1, 1]} : vector<64x16xf32> to vector<16x16xf32>
    %160 = vector.extract_strided_slice %127 {offsets = [128, 0], sizes = [32, 16], strides = [1, 1]} : vector<192x16xf32> to vector<32x16xf32>
    %cst_57 = arith.constant dense<0.000000e+00> : vector<16x32xf32>
    %161 = tpu.matmul %159, %160, %cst_57 {dimension_numbers = #tpu.dot_dimension_numbers<[1], [1], [0], [0], [0, 0, 1, 0], [], []>} : vector<16x16xf32>, vector<32x16xf32>, vector<16x32xf32> -> vector<16x32xf32>
    %162 = arith.addf %158, %161 : vector<16x32xf32>
    %163 = vector.extract_strided_slice %151 {offsets = [48, 0], sizes = [16, 16], strides = [1, 1]} : vector<64x16xf32> to vector<16x16xf32>
    %164 = vector.extract_strided_slice %127 {offsets = [160, 0], sizes = [32, 16], strides = [1, 1]} : vector<192x16xf32> to vector<32x16xf32>
    %cst_58 = arith.constant dense<0.000000e+00> : vector<16x32xf32>
    %165 = tpu.matmul %163, %164, %cst_58 {dimension_numbers = #tpu.dot_dimension_numbers<[1], [1], [0], [0], [0, 0, 1, 0], [], []>} : vector<16x16xf32>, vector<32x16xf32>, vector<16x32xf32> -> vector<16x32xf32>
    %166 = arith.addf %162, %165 : vector<16x32xf32>
    %167 = vector.broadcast %118 : vector<1x32xf32> to vector<16x32xf32>
    %168 = arith.addf %166, %167 : vector<16x32xf32>
    %169 = arith.addf %113, %168 : vector<16x32xf32>
    %170 = arith.mulf %169, %169 : vector<16x32xf32>
    %171 = tpu.concatenate %169, %170 in 0 : vector<16x32xf32>, vector<16x32xf32> -> vector<32x32xf32>
    %cst_59 = arith.constant dense<0.000000e+00> : vector<32xf32>
    %172 = vector.multi_reduction <add>, %171, %cst_59 [1] : vector<32x32xf32> to vector<32xf32>
    %173 = vector.shape_cast %172 : vector<32xf32> to vector<32x1xf32>
    %cst_60 = arith.constant 3.200000e+01 : f32
    %174 = vector.broadcast %cst_60 : f32 to vector<32x1xf32>
    %175 = arith.divf %173, %174 : vector<32x1xf32>
    %176 = vector.extract_strided_slice %175 {offsets = [0, 0], sizes = [16, 1], strides = [1, 1]} : vector<32x1xf32> to vector<16x1xf32>
    %177 = vector.extract_strided_slice %175 {offsets = [16, 0], sizes = [16, 1], strides = [1, 1]} : vector<32x1xf32> to vector<16x1xf32>
    %178 = arith.mulf %176, %176 : vector<16x1xf32>
    %179 = arith.subf %177, %178 : vector<16x1xf32>
    %180 = vector.broadcast %176 : vector<16x1xf32> to vector<16x32xf32>
    %181 = arith.subf %169, %180 : vector<16x32xf32>
    %cst_61 = arith.constant 9.99999974E-6 : f32
    %182 = vector.broadcast %cst_61 : f32 to vector<16x1xf32>
    %183 = arith.addf %179, %182 : vector<16x1xf32>
    %184 = math.rsqrt %183 : vector<16x1xf32>
    %185 = vector.broadcast %184 : vector<16x1xf32> to vector<16x32xf32>
    %186 = arith.mulf %181, %185 : vector<16x32xf32>
    %187 = vector.broadcast %121 : vector<1x32xf32> to vector<16x32xf32>
    %188 = arith.mulf %186, %187 : vector<16x32xf32>
    %189 = vector.broadcast %122 : vector<1x32xf32> to vector<16x32xf32>
    %190 = arith.addf %188, %189 : vector<16x32xf32>
    %cst_62 = arith.constant dense<0.000000e+00> : vector<16x64xf32>
    %191 = tpu.matmul %190, %116, %cst_62 {dimension_numbers = #tpu.dot_dimension_numbers<[1], [0], [0], [1], [0, 0, 1, 1], [], []>} : vector<16x32xf32>, vector<32x64xf32>, vector<16x64xf32> -> vector<16x64xf32>
    %192 = vector.broadcast %119 : vector<1x64xf32> to vector<16x64xf32>
    %193 = arith.addf %191, %192 : vector<16x64xf32>
    %cst_63 = arith.constant 0.000000e+00 : f32
    %194 = vector.broadcast %cst_63 : f32 to vector<16x64xf32>
    %195 = arith.maximumf %193, %194 : vector<16x64xf32>
    %cst_64 = arith.constant dense<0.000000e+00> : vector<16x32xf32>
    %196 = tpu.matmul %195, %117, %cst_64 {dimension_numbers = #tpu.dot_dimension_numbers<[1], [0], [0], [1], [0, 0, 1, 1], [], []>} : vector<16x64xf32>, vector<64x32xf32>, vector<16x32xf32> -> vector<16x32xf32>
    %197 = vector.broadcast %120 : vector<1x32xf32> to vector<16x32xf32>
    %198 = arith.addf %196, %197 : vector<16x32xf32>
    %199 = arith.addf %190, %198 : vector<16x32xf32>
    %200 = arith.mulf %199, %199 : vector<16x32xf32>
    %201 = tpu.concatenate %199, %200 in 0 : vector<16x32xf32>, vector<16x32xf32> -> vector<32x32xf32>
    %cst_65 = arith.constant dense<0.000000e+00> : vector<32xf32>
    %202 = vector.multi_reduction <add>, %201, %cst_65 [1] : vector<32x32xf32> to vector<32xf32>
    %203 = vector.shape_cast %202 : vector<32xf32> to vector<32x1xf32>
    %cst_66 = arith.constant 3.200000e+01 : f32
    %204 = vector.broadcast %cst_66 : f32 to vector<32x1xf32>
    %205 = arith.divf %203, %204 : vector<32x1xf32>
    %206 = vector.extract_strided_slice %205 {offsets = [0, 0], sizes = [16, 1], strides = [1, 1]} : vector<32x1xf32> to vector<16x1xf32>
    %207 = vector.extract_strided_slice %205 {offsets = [16, 0], sizes = [16, 1], strides = [1, 1]} : vector<32x1xf32> to vector<16x1xf32>
    %208 = arith.mulf %206, %206 : vector<16x1xf32>
    %209 = arith.subf %207, %208 : vector<16x1xf32>
    %210 = vector.broadcast %206 : vector<16x1xf32> to vector<16x32xf32>
    %211 = arith.subf %199, %210 : vector<16x32xf32>
    %cst_67 = arith.constant 9.99999974E-6 : f32
    %212 = vector.broadcast %cst_67 : f32 to vector<16x1xf32>
    %213 = arith.addf %209, %212 : vector<16x1xf32>
    %214 = math.rsqrt %213 : vector<16x1xf32>
    %215 = vector.broadcast %214 : vector<16x1xf32> to vector<16x32xf32>
    %216 = arith.mulf %211, %215 : vector<16x32xf32>
    %217 = vector.broadcast %123 : vector<1x32xf32> to vector<16x32xf32>
    %218 = arith.mulf %216, %217 : vector<16x32xf32>
    %219 = vector.broadcast %124 : vector<1x32xf32> to vector<16x32xf32>
    %220 = arith.addf %218, %219 : vector<16x32xf32>
    %221 = vector.extract_strided_slice %220 {offsets = [7, 0], sizes = [1, 32], strides = [1, 1]} : vector<16x32xf32> to vector<1x32xf32>
    %222 = vector.extract_strided_slice %220 {offsets = [15, 0], sizes = [1, 32], strides = [1, 1]} : vector<16x32xf32> to vector<1x32xf32>
    %223 = tpu.concatenate %221, %222 in 0 : vector<1x32xf32>, vector<1x32xf32> -> vector<2x32xf32>
    %c1096 = arith.constant 1096 : index
    %c0_68 = arith.constant 0 : index
    %224 = vector.load %arg2[%c1096, %c0_68] : memref<1200x128xf32, #tpu.memory_space<vmem>>, vector<2x8xf32>
    %cst_69 = arith.constant dense<0.000000e+00> : vector<2x8xf32>
    %225 = tpu.matmul %1, %224, %cst_69 {dimension_numbers = #tpu.dot_dimension_numbers<[1], [0], [0], [1], [0, 0, 1, 1], [], []>} : vector<2x2xf32>, vector<2x8xf32>, vector<2x8xf32> -> vector<2x8xf32>
    %c1104 = arith.constant 1104 : index
    %c0_70 = arith.constant 0 : index
    %226 = vector.load %arg2[%c1104, %c0_70] : memref<1200x128xf32, #tpu.memory_space<vmem>>, vector<1x8xf32>
    %227 = vector.broadcast %226 : vector<1x8xf32> to vector<2x8xf32>
    %228 = arith.addf %225, %227 : vector<2x8xf32>
    %cst_71 = arith.constant 0.000000e+00 : f32
    %229 = vector.broadcast %cst_71 : f32 to vector<2x8xf32>
    %230 = arith.maximumf %228, %229 : vector<2x8xf32>
    %c1112 = arith.constant 1112 : index
    %c0_72 = arith.constant 0 : index
    %231 = vector.load %arg2[%c1112, %c0_72] : memref<1200x128xf32, #tpu.memory_space<vmem>>, vector<32x32xf32>
    %cst_73 = arith.constant dense<0.000000e+00> : vector<2x32xf32>
    %232 = tpu.matmul %223, %231, %cst_73 {dimension_numbers = #tpu.dot_dimension_numbers<[1], [0], [0], [1], [0, 0, 1, 1], [], []>} : vector<2x32xf32>, vector<32x32xf32>, vector<2x32xf32> -> vector<2x32xf32>
    %c1144 = arith.constant 1144 : index
    %c0_74 = arith.constant 0 : index
    %233 = vector.load %arg2[%c1144, %c0_74] : memref<1200x128xf32, #tpu.memory_space<vmem>>, vector<8x32xf32>
    %cst_75 = arith.constant dense<0.000000e+00> : vector<2x32xf32>
    %234 = tpu.matmul %230, %233, %cst_75 {dimension_numbers = #tpu.dot_dimension_numbers<[1], [0], [0], [1], [0, 0, 1, 1], [], []>} : vector<2x8xf32>, vector<8x32xf32>, vector<2x32xf32> -> vector<2x32xf32>
    %235 = arith.addf %232, %234 : vector<2x32xf32>
    %c1152 = arith.constant 1152 : index
    %c0_76 = arith.constant 0 : index
    %236 = vector.load %arg2[%c1152, %c0_76] : memref<1200x128xf32, #tpu.memory_space<vmem>>, vector<1x32xf32>
    %237 = vector.broadcast %236 : vector<1x32xf32> to vector<2x32xf32>
    %238 = arith.addf %235, %237 : vector<2x32xf32>
    %cst_77 = arith.constant 0.000000e+00 : f32
    %239 = vector.broadcast %cst_77 : f32 to vector<2x32xf32>
    %240 = arith.maximumf %238, %239 : vector<2x32xf32>
    %c1160 = arith.constant 1160 : index
    %c0_78 = arith.constant 0 : index
    %241 = vector.load %arg2[%c1160, %c0_78] : memref<1200x128xf32, #tpu.memory_space<vmem>>, vector<32x32xf32>
    %cst_79 = arith.constant dense<0.000000e+00> : vector<2x32xf32>
    %242 = tpu.matmul %240, %241, %cst_79 {dimension_numbers = #tpu.dot_dimension_numbers<[1], [0], [0], [1], [0, 0, 1, 1], [], []>} : vector<2x32xf32>, vector<32x32xf32>, vector<2x32xf32> -> vector<2x32xf32>
    %c1192 = arith.constant 1192 : index
    %c0_80 = arith.constant 0 : index
    %243 = vector.load %arg2[%c1192, %c0_80] : memref<1200x128xf32, #tpu.memory_space<vmem>>, vector<1x32xf32>
    %244 = vector.broadcast %243 : vector<1x32xf32> to vector<2x32xf32>
    %245 = arith.addf %242, %244 : vector<2x32xf32>
    %cst_81 = arith.constant -1.000000e+04 : f32
    %cst_82 = arith.constant 1.000000e+04 : f32
    %246 = vector.broadcast %cst_81 : f32 to vector<2x32xf32>
    %247 = arith.maximumf %246, %245 : vector<2x32xf32>
    %248 = vector.broadcast %cst_82 : f32 to vector<2x32xf32>
    %249 = arith.minimumf %248, %247 : vector<2x32xf32>
    %cst_83 = arith.constant dense<0xFF800000> : vector<2xf32>
    %250 = vector.multi_reduction <maximumf>, %249, %cst_83 [1] : vector<2x32xf32> to vector<2xf32>
    %251 = vector.shape_cast %250 : vector<2xf32> to vector<2x1xf32>
    %252 = vector.broadcast %251 : vector<2x1xf32> to vector<2x32xf32>
    %253 = arith.subf %249, %252 : vector<2x32xf32>
    %254 = math.exp %253 : vector<2x32xf32>
    %c88 = arith.constant 88 : index
    %c0_84 = arith.constant 0 : index
    %255 = vector.load %arg2[%c88, %c0_84] : memref<1200x128xf32, #tpu.memory_space<vmem>>, vector<32x32xf32>
    %cst_85 = arith.constant dense<0.000000e+00> : vector<2x32xf32>
    %256 = tpu.matmul %254, %255, %cst_85 {dimension_numbers = #tpu.dot_dimension_numbers<[1], [0], [0], [1], [0, 0, 1, 1], [], []>} : vector<2x32xf32>, vector<32x32xf32>, vector<2x32xf32> -> vector<2x32xf32>
    %257 = vector.broadcast %251 : vector<2x1xf32> to vector<2x32xf32>
    %258 = arith.subf %249, %257 : vector<2x32xf32>
    %259 = math.log %256 : vector<2x32xf32>
    %260 = arith.subf %258, %259 : vector<2x32xf32>
    %c0_86 = arith.constant 0 : index
    %c0_87 = arith.constant 0 : index
    %261 = vector.load %arg3[%c0_86, %c0_87] : memref<2x32xf32, #tpu.memory_space<vmem>>, vector<2x32xf32>
    tpu.vector_store %arg3[%c0_86, %c0_87], %260 {strides = array<i32>} : memref<2x32xf32, #tpu.memory_space<vmem>>, vector<2x32xf32>,
    return
  }
  func.func @transform_0(%arg0: i32) -> (i32, i32) {
    %c0_i32 = arith.constant 0 : i32
    %c0_i32_0 = arith.constant 0 : i32
    %c0_i32_1 = arith.constant 0 : i32
    return %c0_i32, %c0_i32_0 : i32, i32
  }
  func.func @transform_1(%arg0: i32) -> (i32, i32) {
    %c0_i32 = arith.constant 0 : i32
    %c0_i32_0 = arith.constant 0 : i32
    %c0_i32_1 = arith.constant 0 : i32
    return %c0_i32, %c0_i32_0 : i32, i32
  }
  func.func @transform_2(%arg0: i32) -> (i32, i32) {
    %c0_i32 = arith.constant 0 : i32
    %c0_i32_0 = arith.constant 0 : i32
    %c0_i32_1 = arith.constant 0 : i32
    return %c0_i32, %c0_i32_0 : i32, i32
  }
}

</mosaic_0001>

<bundles_post_ra>
// kernel: rainbow_forward.1
= control target key start
LH: loop header
LB: loop body
LE: loop exit
PB: predicated region body
PF: predicated region fallthrough
CT: control target
= control target key end

     0   :  { %7 = vsyncpa [#allocation3], 0  ;;  %s4786_s9 = smov [#allocation2]   ;;  %s5278_s0 = inlined_call_operand.vmem [shape: f32[18,4], index: 0, kind: input, shape index: {}]   ;;  %s5279_s1 = inlined_call_operand.hbm [shape: f32[1200,128], index: 1, kind: input, shape index: {}]   ;;  %s5280_s2 = inlined_call_operand.vmem [shape: f32[2,32], index: 2, kind: output, shape index: {}]  }
   0x1   :  { %s15_s10 = sshll.u32 %s4786_s9, 4  ;;  %s4762_s13 = scalar_lea.hbm %s5279_s1, 19200  ;;  %s16_s10 = int_to_ptr.vmem [resolvable:$true] %s15_s10 }
   0x2   :  { %p4763_p0 = scmp.ne.s32.totalorder %s5279_s1, %s4762_s13  ;;  %p4766_p1 = scmp.lt.u32.totalorder %s4762_s13, %s5279_s1 }
   0x4   :  { %p4768_p2 = pnand %p4766_p1, %p4763_p0 }
   0x6   :  { %4771 = shalt.err (!%p4768_p2)
}
   0x7   :  { %s4772_s18 = scalar_lea.vmem %s16_s10, 19200  ;;  %p4777_p4 = scmp.lt.s32.totalorder %s16_s10, %s16_s10 }
   0x8   :  { %p4773_p3 = scmp.ne.s32.totalorder %s16_s10, %s4772_s18  ;;  %p4778_p5 = scmp.lt.s32.totalorder %s4772_s18, %s4772_s18 }
   0xa   :  { %p4779_p6 = por %p4778_p5, %p4777_p4 }
   0xc   :  { %p4780_p7 = pnand %p4779_p6, %p4773_p3 }
   0xe   :  { %4783 = shalt.err (!%p4780_p7)
}
   0xf   :  { %s4787_s19 = smov 128   ;;  %s4788_s20 = smov 8  }
  0x10   :  { %21 = dma.hbm_to_vmem [thread:$0]  %s5279_s1, 19200, %s16_s10, [#allocation3], %s4787_s19, %s4787_s19, %s4788_s20  }
  0x11   :  { %4784 = dma.done.wait [#allocation3], 19200  }
  0x12   :  { %4785 = vsyncadd [#allocation3], 4294948096  ;;  %vm38_vm0 = vcmask 1043456   ;;  %vm31_vm1 = vcmask 31744   ;;  %v28_v0 = vld [vmem:[#allocation2] sm:$0xf] }
  0x13   :  { %v25_v1 = vld [vmem:[%s5278_s0] sm:$0xff]  ;;  %v26_v2 = vld [vmem:[%s5278_s0 + $0x8] sm:$0xff]  ;;  %4167 = vmatprep.subr.msk.mxu0 %vm38_vm0, %v28_v0  ;;  %vm312_vm2 = vcmask 261120   ;;  %v125_v3 = vld [vmem:[#allocation2 + $0x78] sm:$0xff]  ;;  %v4789_v6 = vmov 0   ;;  %vm608_vm4 = vcmask 64512  }
  0x14   :  { %4169 = vmatprep.mubr.msk.f32.mxu0 %vm31_vm1, %v25_v1  ;;  %4168 = vmatpush3.msk.msra.mxu0 %vm38_vm0, %v28_v0  ;;  %v149_v4 = vld [vmem:[#allocation2 + $0x138] sm:$0xff]  ;;  %v150_v7 = vld [vmem:[#allocation2 + $0x140] sm:$0xff]  ;;  %v151_v8 = vld [vmem:[#allocation2 + $0x148] sm:$0xff]  ;;  %vm1037_vm5 = vcmask 130048   ;;  %vm1644_vm7 = vcmask 523264   ;;  %vm4791_vm8 = vmmov 0  }
  0x15   :  { %4170 = vmatmul.mubr.msk.f32.vlgmr.msra.gmra.mrb[0].mxu0 %vm31_vm1, %v26_v2  ;;  %4176 = vmatprep.mubr.msk.f32.mxu1 %vm312_vm2, %v125_v3  ;;  %v153_v5 = vld [vmem:[#allocation2 + $0x158] sm:$0xff]  ;;  %v154_v9 = vld [vmem:[#allocation2 + $0x160] sm:$0xff]  ;;  %v152_v10 = vld [vmem:[#allocation2 + $0x150] sm:$0xff]  ;;  %vm3428_vm9 = vcmask 1041408   ;;  %vm3424_vm10 = vcmask 15360   ;;  %vm3416_vm11 = vcmask 1040384  }
  0x16   :  { %4676 = vset.pattern.permute.xlu0 %v4789_v6  ;;  %4677 = vset.pattern.permute.xlu1 %v4789_v6  ;;  %v155_v11 = vld [vmem:[#allocation2 + $0x168] sm:$0xff]  ;;  %v30_v12 = vld [vmem:[#allocation2 + $0x10] sm:$0xff]  ;;  %vm4833_vm3 = vmpackc.low %vm312_vm2, %vm312_vm2  ;;  %vm3745_vm12 = vcmask 254976  }
  0x17   :  { %194 = vperm.xlu0 %4676, %v149_v4   ;;  %214 = vperm.xlu1 %4677, %v153_v5   ;;  %v29_v13 = vld [vmem:[#allocation2 + $0x8] sm:$0xff]  ;;  %v126_v20 = vld [vmem:[#allocation2 + $0x80] sm:$0xff]  ;;  %v128_v22 = vld [vmem:[#allocation2 + $0x90] sm:$0xff] }
  0x18   :  { %v127_v21 = vld [vmem:[#allocation2 + $0x88] sm:$0xff]  ;;  %v129_v23 = vld [vmem:[#allocation2 + $0x98] sm:$0xff]  ;;  %v130_v24 = vld [vmem:[#allocation2 + $0xa0] sm:$0xff] }
  0x19   :  { %v131_v25 = vld [vmem:[#allocation2 + $0xa8] sm:$0xff]  ;;  %v132_v26 = vld [vmem:[#allocation2 + $0xb0] sm:$0xff]  ;;  %v133_v27 = vld [vmem:[#allocation2 + $0xb8] sm:$0xff] }
  0x1a   :  { %v134_v28 = vld [vmem:[#allocation2 + $0xc0] sm:$0xff]  ;;  %v135_v29 = vld [vmem:[#allocation2 + $0xc8] sm:$0xff]  ;;  %v136_v30 = vld [vmem:[#allocation2 + $0xd0] sm:$0xff] }
  0x1b   :  { %199 = vperm.xlu0 %4676, %v150_v7   ;;  %204 = vperm.xlu1 %4677, %v151_v8   ;;  %v137_v31 = vld [vmem:[#allocation2 + $0xd8] sm:$0xff]  ;;  %v138_v32 = vld [vmem:[#allocation2 + $0xe0] sm:$0xff]  ;;  %v139_v33 = vld [vmem:[#allocation2 + $0xe8] sm:$0xff] }
  0x1c   :  { %v140_v34 = vld [vmem:[#allocation2 + $0xf0] sm:$0xff]  ;;  %v162_v60 = vld [vmem:[#allocation2 + $0x1a0] sm:$0xff]  ;;  %v161_v0 = vld [vmem:[#allocation2 + $0x198] sm:$0xff] }
  0x1d   :  { %v156_v61 = vld [vmem:[#allocation2 + $0x170] sm:$0xff]  ;;  %v157_v2 = vld [vmem:[#allocation2 + $0x178] sm:$0xff]  ;;  %v163_v3 = vld [vmem:[#allocation2 + $0x1a8] sm:$0xff] }
  0x1e   :  { %v164_v62 = vld [vmem:[#allocation2 + $0x1b0] sm:$0xff]  ;;  %v158_v5 = vld [vmem:[#allocation2 + $0x180] sm:$0xff]  ;;  %v159_v6 = vld [vmem:[#allocation2 + $0x188] sm:$0xff] }
  0x1f   :  { %219 = vperm.xlu0 %4676, %v154_v9   ;;  %209 = vperm.xlu1 %4677, %v152_v10   ;;  %v160_v7 = vld [vmem:[#allocation2 + $0x190] sm:$0xff]  ;;  %v141_v8 = vld [vmem:[#allocation2 + $0xf8] sm:$0xff]  ;;  %v142_v9 = vld [vmem:[#allocation2 + $0x100] sm:$0xff] }
  0x20   :  { %vm4878_vm6 = vmpackc.low %vm1037_vm5, %vm1037_vm5  ;;  %v1777_v18 = vld [vmem:[#allocation2 + $0x298] sm:$0xff] }
  0x23   :  { %224 = vperm.xlu1 %4677, %v155_v11  }
  0x96   :  { %v195_v35 = vpop.permute.xlu0 %194  ;;  %v215_v36 = vpop.permute.xlu1 %214 }
  0x9a   :  { %v200_v37 = vpop.permute.xlu0 %199  ;;  %v205_v39 = vpop.permute.xlu1 %204 }
  0x9e   :  { %v210_v46 = vpop.permute.xlu1 %209  ;;  %v220_v51 = vpop.permute.xlu0 %219 }
  0xa2   :  { %v225_v10 = vpop.permute.xlu1 %224 }
  0xe8   :  { %v4171_v14 = vpop.f32.mrb[0].mxu0 }
  0xe9   :  { %v4827_v15 = vadd.f32 %v4171_v14, %v30_v12  ;;  %v108_v16 = vpop.f32.mrb[1].mxu0 }
  0xea   :  { %v4829_v17 = vadd.f32 %v108_v16, %v29_v13 }
  0xec   :  { %v4483_v19 = vpack.c.bf16 %v4827_v15, %v4829_v17 }
  0xee   :  { %4485 = vmatprep.subr.msk.bf16.mxu1 %vm4833_vm3, %v4483_v19 }
  0xef   :  { %4488 = vmatpush3.bf16.xpose.msk.msra.mxu1 %vm4833_vm3, %v4483_v19 }
  0xf6   :  { %4177 = vmatmul.mubr.msk.f32.vlgmr.msra.gmra.mrb[0].mxu1 %vm312_vm2, %v126_v20 }
  0xf7   :  { %4179 = vmatprep.mubr.msk.f32.mxu1 %vm312_vm2, %v127_v21 }
  0xfa   :  { %4180 = vmatmul.mubr.msk.f32.gmra.mrb[2].mxu1 %vm312_vm2, %v128_v22 }
  0xfb   :  { %4182 = vmatprep.mubr.msk.f32.mxu1 %vm312_vm2, %v129_v23 }
  0xfe   :  { %4183 = vmatmul.mubr.msk.f32.gmra.mrb[4].mxu1 %vm312_vm2, %v130_v24 }
  0xff   :  { %4185 = vmatprep.mubr.msk.f32.mxu1 %vm312_vm2, %v131_v25 }
 0x102   :  { %4186 = vmatmul.mubr.msk.f32.gmra.mrb[6].mxu1 %vm312_vm2, %v132_v26 }
 0x103   :  { %4188 = vmatprep.mubr.msk.f32.mxu1 %vm312_vm2, %v133_v27 }
 0x106   :  { %4189 = vmatmul.mubr.msk.f32.gmra.mrb[8].mxu1 %vm312_vm2, %v134_v28 }
 0x107   :  { %4191 = vmatprep.mubr.msk.f32.mxu1 %vm312_vm2, %v135_v29 }
 0x10a   :  { %4192 = vmatmul.mubr.msk.f32.gmra.mrb[10].mxu1 %vm312_vm2, %v136_v30 }
 0x10b   :  { %4194 = vmatprep.mubr.msk.f32.mxu1 %vm312_vm2, %v137_v31 }
 0x10e   :  { %4195 = vmatmul.mubr.msk.f32.gmra.mrb[12].mxu1 %vm312_vm2, %v138_v32 }
 0x10f   :  { %4197 = vmatprep.mubr.msk.f32.mxu1 %vm312_vm2, %v139_v33 }
 0x112   :  { %4198 = vmatmul.mubr.msk.f32.gmra.mrb[14].mxu1 %vm312_vm2, %v140_v34 }
 0x113   :  { %4200 = vmatprep.mubr.msk.f32.mxu1 %vm312_vm2, %v141_v8 }
 0x116   :  { %4201 = vmatmul.mubr.msk.f32.gmra.mrb[16].mxu1 %vm312_vm2, %v142_v9 }
 0x1c9   :  { %v4178_v38 = vpop.f32.mrb[0].mxu1 }
 0x1ca   :  { %v463_v40 = vadd.f32 %v4178_v38, %v200_v37  ;;  %v457_v41 = vpop.f32.mrb[1].mxu1 }
 0x1cb   :  { %v458_v42 = vadd.f32 %v457_v41, %v195_v35 }
 0x1cc   :  { %690 = vxpose.xlu1.b32.start.end [1/1] (short) (narrow) %v463_v40, 16 }
 0x1cd   :  { %v4181_v43 = vpop.f32.mrb[2].mxu1  ;;  %576 = vxpose.xlu0.b32.start.end [1/1] (short) (narrow) %v458_v42, 16 }
 0x1ce   :  { %v467_v44 = vpop.f32.mrb[3].mxu1  ;;  %v473_v49 = vadd.f32 %v4181_v43, %v210_v46  ;;  %v143_v46 = vld [vmem:[#allocation2 + $0x108] sm:$0xff] }
 0x1cf   :  { %v468_v45 = vadd.f32 %v467_v44, %v205_v39  ;;  %4203 = vmatprep.mubr.msk.f32.mxu1 %vm312_vm2, %v143_v46 }
 0x1d1   :  { %v4184_v47 = vpop.f32.mrb[4].mxu1  ;;  %803 = vxpose.xlu1.b32.start.end [1/1] (short) (narrow) %v468_v45, 16 }
 0x1d2   :  { %v477_v48 = vpop.f32.mrb[5].mxu1  ;;  %v483_v52 = vadd.f32 %v4184_v47, %v220_v51  ;;  %v144_v47 = vld [vmem:[#allocation2 + $0x110] sm:$0xff] }
 0x1d3   :  { %v478_v50 = vadd.f32 %v477_v48, %v215_v36  ;;  %v145_v48 = vld [vmem:[#allocation2 + $0x118] sm:$0xff]  ;;  %4204 = vmatmul.mubr.msk.f32.gmra.mrb[18].mxu1 %vm312_vm2, %v144_v47 }
 0x1d4   :  { %4206 = vmatprep.mubr.msk.f32.mxu1 %vm312_vm2, %v145_v48  ;;  %v169_v47 = vld [vmem:[#allocation2 + $0x1d8] sm:$0xff] }
 0x1d5   :  { %4212 = vmatprep.subr.mxu0 %v478_v50  ;;  %v4187_v53 = vpop.f32.mrb[6].mxu1 }
 0x1d6   :  { %4213 = vmatpush3.msra.mxu0 %v478_v50  ;;  %916 = vxpose.xlu1.b32.start.end [1/1] (short) (narrow) %v473_v49, 16  ;;  %v487_v54 = vpop.f32.mrb[7].mxu1  ;;  %v146_v49 = vld [vmem:[#allocation2 + $0x120] sm:$0xff] }
 0x1d7   :  { %4217 = vmatprep.subr.mxu0 %v483_v52  ;;  %v488_v16 = vadd.f32 %v487_v54, %v225_v10  ;;  %4207 = vmatmul.mubr.msk.f32.gmra.mrb[20].mxu1 %vm312_vm2, %v146_v49  ;;  %v4905_v50 = vld [vmem:[#allocation2 + $0x20] sm:$0xff]  ;;  %v147_v10 = vld [vmem:[#allocation2 + $0x128] sm:$0xff] }
 0x1d8   :  { %4209 = vmatprep.mubr.msk.f32.mxu1 %vm312_vm2, %v147_v10 }
 0x1d9   :  { %v4858_v55 = vpop.f32.mrb[8].mxu1 }
 0x1da   :  { %v4860_v56 = vpop.f32.mrb[9].mxu1 }
 0x1dd   :  { %v4862_v57 = vpop.f32.mrb[10].mxu1 }
 0x1de   :  { %v4864_v58 = vpop.f32.mrb[11].mxu1 }
 0x1e1   :  { %v4196_v59 = vpop.f32.mrb[12].mxu1 }
 0x1e2   :  { %v517_v63 = vpop.f32.mrb[13].mxu1 }
 0x1e5   :  { %v4199_v1 = vpop.f32.mrb[14].mxu1 }
 0x1e6   :  { %v527_v4 = vpop.f32.mrb[15].mxu1 }
 0x1f8   :  { %259 = vperm.xlu1 %4677, %v162_v60  }
 0x1fa   :  { %229 = vperm.xlu0 %4676, %v156_v61  }
 0x1fc   :  { %269 = vperm.xlu1 %4677, %v164_v62  }
 0x1fe   :  { %254 = vperm.xlu0 %4676, %v161_v0  }
 0x200   :  { %234 = vperm.xlu1 %4677, %v157_v2   ;;  %v4924_v2 = vld [vmem:[#allocation2 + $0x38] sm:$0xff] }
 0x202   :  { %264 = vperm.xlu0 %4676, %v163_v3  }
 0x204   :  { %239 = vperm.xlu1 %4677, %v158_v5  }
 0x206   :  { %244 = vperm.xlu0 %4676, %v159_v6  }
 0x208   :  { %249 = vperm.xlu1 %4677, %v160_v7  }
 0x24c   :  { %v706_v11 = vpop.trf.xlu1 }
 0x24d   :  { %v592_v12 = vpop.trf.xlu0 }
 0x24e   :  { %4214 = vmatprep.mubr.msk.f32.mxu0 %vm608_vm4, %v592_v12  ;;  %v4940_v12 = vld [vmem:[#allocation2 + $0x50] sm:$0xff] }
 0x250   :  { %v707_v13 = vpop.trf.xlu1 }
 0x251   :  { %v593_v14 = vpop.trf.xlu0 }
 0x252   :  { %4215 = vmatmul.mubr.msk.f32.vlgmr.msra.gmra.mrb[2].mxu0 %vm608_vm4, %v593_v14 }
 0x253   :  { %4218 = vmatpush3.msra.mxu0 %v483_v52  ;;  %4219 = vmatprep.mubr.msk.f32.mxu0 %vm608_vm4, %v706_v11  ;;  %v4907_v52 = vld [vmem:[#allocation2 + $0x18] sm:$0xff]  ;;  %v148_v11 = vld [vmem:[#allocation2 + $0x130] sm:$0xff] }
 0x254   :  { %4222 = vmatprep.subr.mxu0 %v488_v16  ;;  %v819_v19 = vpop.trf.xlu1  ;;  %4210 = vmatmul.mubr.msk.f32.gmra.mrb[22].mxu1 %vm312_vm2, %v148_v11 }
 0x256   :  { %4220 = vmatmul.mubr.msk.f32.vlgmr.msra.gmra.mrb[4].mxu0 %vm608_vm4, %v707_v13  ;;  %v4942_v13 = vld [vmem:[#allocation2 + $0x48] sm:$0xff] }
 0x257   :  { %4223 = vmatpush3.msra.mxu0 %v488_v16  ;;  %4224 = vmatprep.mubr.msk.f32.mxu0 %vm608_vm4, %v819_v19 }
 0x258   :  { %v820_v20 = vpop.trf.xlu1 }
 0x25a   :  { %4225 = vmatmul.mubr.msk.f32.vlgmr.msra.gmra.mrb[6].mxu0 %vm608_vm4, %v820_v20 }
 0x25c   :  { %v932_v21 = vpop.trf.xlu1 }
 0x25d   :  { %4229 = vmatprep.mubr.msk.f32.mxu0 %vm608_vm4, %v932_v21 }
 0x260   :  { %v933_v22 = vpop.trf.xlu1 }
 0x277   :  { %v260_v23 = vpop.permute.xlu1 %259 }
 0x278   :  { %v523_v28 = vadd.f32 %v4196_v59, %v260_v23  ;;  %v166_v23 = vld [vmem:[#allocation2 + $0x1c0] sm:$0xff] }
 0x279   :  { %v230_v24 = vpop.permute.xlu0 %229 }
 0x27a   :  { %v493_v25 = vadd.f32 %v4187_v53, %v230_v24  ;;  %v4202_v24 = vpop.f32.mrb[16].mxu1 }
 0x27b   :  { %v270_v26 = vpop.permute.xlu1 %269 }
 0x27c   :  { %4227 = vmatprep.subr.mxu0 %v493_v25  ;;  %v533_v34 = vadd.f32 %v4199_v1, %v270_v26  ;;  %v165_v26 = vld [vmem:[#allocation2 + $0x1b8] sm:$0xff] }
 0x27d   :  { %4228 = vmatpush3.msra.mxu0 %v493_v25  ;;  %v255_v27 = vpop.permute.xlu0 %254  ;;  %v537_v25 = vpop.f32.mrb[17].mxu1 }
 0x27e   :  { %v518_v29 = vadd.f32 %v517_v63, %v255_v27  ;;  %4230 = vmatmul.mubr.msk.f32.vlgmr.msra.gmra.mrb[8].mxu0 %vm608_vm4, %v933_v22  ;;  %v4920_v63 = vld [vmem:[#allocation2 + $0x40] sm:$0xff] }
 0x27f   :  { %v235_v30 = vpop.permute.xlu1 %234 }
 0x280   :  { %v4489_v32 = vpack.c.bf16 %v523_v28, %v518_v29  ;;  %v498_v37 = vadd.f32 %v4860_v56, %v235_v30 }
 0x281   :  { %v265_v33 = vpop.permute.xlu0 %264 }
 0x282   :  { %v528_v35 = vadd.f32 %v527_v4, %v265_v33  ;;  %4491 = vmatprep.subr.msk.bf16.mxu0 %vm4878_vm6, %v4489_v32 }
 0x283   :  { %v240_v36 = vpop.permute.xlu1 %239 }
 0x284   :  { %v4495_v38 = vpack.c.bf16 %v533_v34, %v528_v35  ;;  %v503_v39 = vadd.f32 %v4858_v55, %v240_v36  ;;  %4494 = vmatpush3.bf16.xpose.msk.msra.mxu0 %vm4878_vm6, %v4489_v32  ;;  %v4910_v55 = vld [vmem:[#allocation2 + $0x30] sm:$0xff] }
 0x285   :  { %v245_v40 = vpop.permute.xlu0 %244 }
 0x286   :  { %v4888_v41 = vpack.c.bf16 %v503_v39, %v498_v37  ;;  %4497 = vmatprep.subr.msk.bf16.mxu0 %vm4878_vm6, %v4495_v38  ;;  %v508_v43 = vadd.f32 %v4864_v58, %v245_v40  ;;  %v4914_v58 = vld [vmem:[#allocation2 + $0x28] sm:$0xff] }
 0x287   :  { %v250_v42 = vpop.permute.xlu1 %249 }
 0x288   :  { %v513_v44 = vadd.f32 %v4862_v57, %v250_v42 }
 0x28a   :  { %v4894_v45 = vpack.c.bf16 %v513_v44, %v508_v43  ;;  %v168_v44 = vld [vmem:[#allocation2 + $0x1d0] sm:$0xff] }
 0x28c   :  { %4500 = vmatpush3.bf16.xpose.msk.msra.mxu0 %vm4878_vm6, %v4495_v38 }
 0x28d   :  { %4503 = vmatprep.subr.msk.bf16.mxu0 %vm4878_vm6, %v4888_v41 }
 0x2a6   :  { %v4205_v48 = vpop.f32.mrb[18].mxu1 }
 0x2a7   :  { %v547_v49 = vpop.f32.mrb[19].mxu1 }
 0x325   :  { %v4216_v51 = vpop.f32.mrb[2].mxu0 }
 0x326   :  { %v1030_v53 = vadd.f32 %v4216_v51, %v4905_v50  ;;  %v681_v54 = vpop.f32.mrb[3].mxu0  ;;  %v4963_v51 = vpop.f32.mrb[20].mxu1 }
 0x327   :  { %v1029_v56 = vadd.f32 %v681_v54, %v4907_v52 }
 0x328   :  { %v1041_v57 = vsel %vm1037_vm5, %v1030_v53, -inf }
 0x329   :  { %1042 = vmax.xlane.f32.xlu1 %v1041_v57  ;;  %v4221_v59 = vpop.f32.mrb[4].mxu0  ;;  %v1038_v0 = vsel %vm1037_vm5, %v1029_v56, -inf }
 0x32a   :  { %v1032_v60 = vadd.f32 %v4221_v59, %v4910_v55  ;;  %v794_v61 = vpop.f32.mrb[5].mxu0 }
 0x32b   :  { %v4918_v62 = vadd.f32 %v794_v61, %v4914_v58 }
 0x32c   :  { %v1047_v1 = vsel %vm1037_vm5, %v1032_v60, -inf }
 0x32d   :  { %1039 = vmax.xlane.f32.xlu1 %v1038_v0  ;;  %1048 = vmax.xlane.f32.xlu0 %v1047_v1  ;;  %v4226_v3 = vpop.f32.mrb[6].mxu0  ;;  %v1044_v6 = vsel %vm1037_vm5, %v4918_v62, -inf }
 0x32e   :  { %v4927_v4 = vadd.f32 %v4226_v3, %v4920_v63  ;;  %v907_v5 = vpop.f32.mrb[7].mxu0 }
 0x32f   :  { %v4932_v7 = vadd.f32 %v907_v5, %v4924_v2 }
 0x330   :  { %v1053_v9 = vsel %vm1037_vm5, %v4927_v4, -inf }
 0x331   :  { %1045 = vmax.xlane.f32.xlu1 %v1044_v6  ;;  %v1050_v8 = vsel %vm1037_vm5, %v4932_v7, -inf }
 0x332   :  { %1051 = vmax.xlane.f32.xlu0 %v1050_v8 }
 0x335   :  { %1054 = vmax.xlane.f32.xlu1 %v1053_v9 }
 0x351   :  { %v4231_v14 = vpop.f32.mrb[8].mxu0 }
 0x352   :  { %v4945_v16 = vadd.f32 %v4231_v14, %v4940_v12  ;;  %v1020_v19 = vpop.f32.mrb[9].mxu0 }
 0x353   :  { %v1035_v20 = vadd.f32 %v1020_v19, %v4942_v13 }
 0x354   :  { %v1059_v21 = vsel %vm1037_vm5, %v4945_v16, -inf }
 0x355   :  { %1060 = vmax.xlane.f32.xlu1 %v1059_v21  ;;  %v1056_v22 = vsel %vm1037_vm5, %v1035_v20, -inf }
 0x356   :  { %1057 = vmax.xlane.f32.xlu0 %v1056_v22 }
 0x366   :  { %279 = vperm.xlu1 %4677, %v166_v23  }
 0x36c   :  { %274 = vperm.xlu0 %4676, %v165_v26  }
 0x3b6   :  { %v1043_v27 = vpop.xlane.xlu1 %1042 }
 0x3b7   :  { %v1063_v28 = vsub.f32 %v1030_v53, %v1043_v27  ;;  %v4965_v53 = vpop.f32.mrb[21].mxu1 }
 0x3b9   :  { %v1072_v29 = vmul.f32 1.442695, %v1063_v28 }
 0x3ba   :  { %v1040_v30 = vpop.xlane.xlu1 %1039  ;;  %v1049_v32 = vpop.xlane.xlu0 %1048 }
 0x3bb   :  { %4678 = vpow2.f32 %v1072_v29  ;;  %v1062_v33 = vsub.f32 %v1029_v56, %v1040_v30  ;;  %v1065_v34 = vsub.f32 %v1032_v60, %v1049_v32  ;;  %v167_v56 = vld [vmem:[#allocation2 + $0x1c8] sm:$0xff] }
 0x3bd   :  { %v1070_v35 = vmul.f32 1.442695, %v1062_v33  ;;  %v1076_v36 = vmul.f32 1.442695, %v1065_v34 }
 0x3be   :  { %v1046_v46 = vpop.xlane.xlu1 %1045 }
 0x3bf   :  { %4680 = vpow2.f32 %v1070_v35  ;;  %v1052_v57 = vpop.xlane.xlu0 %1051  ;;  %v1064_v0 = vsub.f32 %v4918_v62, %v1046_v46 }
 0x3c0   :  { %4682 = vpow2.f32 %v1076_v36  ;;  %v1066_v8 = vsub.f32 %v4932_v7, %v1052_v57  ;;  %v172_v36 = vld [vmem:[#allocation2 + $0x1f0] sm:$0xff] }
 0x3c1   :  { %v1074_v6 = vmul.f32 1.442695, %v1064_v0 }
 0x3c2   :  { %v1055_v54 = vpop.xlane.xlu1 %1054  ;;  %v1078_v10 = vmul.f32 1.442695, %v1066_v8 }
 0x3c3   :  { %4684 = vpow2.f32 %v1074_v6  ;;  %v1067_v27 = vsub.f32 %v4927_v4, %v1055_v54 }
 0x3c4   :  { %4686 = vpow2.f32 %v1078_v10 }
 0x3c5   :  { %v4951_v37 = vpop.eup %4678  ;;  %v1080_v28 = vmul.f32 1.442695, %v1067_v27 }
 0x3c6   :  { %v1089_v38 = vsel %vm1037_vm5, %v4951_v37, 0.0 }
 0x3c7   :  { %1090 = vadd.xlane.f32.xlu1 %v1089_v38 }
 0x3c9   :  { %v4955_v39 = vpop.eup %4680 }
 0x3ca   :  { %v1086_v40 = vsel %vm1037_vm5, %v4955_v39, 0.0  ;;  %v4959_v42 = vpop.eup %4682 }
 0x3cb   :  { %1087 = vadd.xlane.f32.xlu0 %v1086_v40  ;;  %v1095_v43 = vsel %vm1037_vm5, %v4959_v42, 0.0 }
 0x3cd   :  { %v4685_v19 = vpop.eup %4684 }
 0x3ce   :  { %v1092_v21 = vsel %vm1037_vm5, %v4685_v19, 0.0  ;;  %v4972_v22 = vpop.eup %4686 }
 0x3cf   :  { %1096 = vadd.xlane.f32.xlu0 %v1095_v43  ;;  %v1098_v62 = vsel %vm1037_vm5, %v4972_v22, 0.0 }
 0x3d8   :  { %289 = vperm.xlu1 %4677, %v168_v44  }
 0x3dc   :  { %294 = vperm.xlu1 %4677, %v169_v47  }
 0x3e2   :  { %v1061_v59 = vpop.xlane.xlu1 %1060 }
 0x3e3   :  { %v1058_v60 = vpop.xlane.xlu0 %1057  ;;  %v1069_v29 = vsub.f32 %v4945_v16, %v1061_v59 }
 0x3e4   :  { %v1068_v11 = vsub.f32 %v1035_v20, %v1058_v60  ;;  %v170_v20 = vld [vmem:[#allocation2 + $0x1e0] sm:$0xff] }
 0x3e5   :  { %284 = vperm.xlu0 %4676, %v167_v56   ;;  %v1084_v30 = vmul.f32 1.442695, %v1069_v29 }
 0x3e6   :  { %v280_v61 = vpop.permute.xlu1 %279  ;;  %v1082_v14 = vmul.f32 1.442695, %v1068_v11 }
 0x3e7   :  { %v543_v3 = vadd.f32 %v4202_v24, %v280_v61  ;;  %v171_v24 = vld [vmem:[#allocation2 + $0x1e8] sm:$0xff] }
 0x3e8   :  { %4688 = vpow2.f32 %v1082_v14 }
 0x3e9   :  { %4690 = vpow2.f32 %v1080_v28 }
 0x3ea   :  { %4692 = vpow2.f32 %v1084_v30 }
 0x3eb   :  { %v275_v1 = vpop.permute.xlu0 %274 }
 0x3ec   :  { %v538_v5 = vadd.f32 %v537_v25, %v275_v1  ;;  %v4980_v25 = vpop.f32.mrb[22].mxu1 }
 0x3ed   :  { %v4982_v26 = vpop.f32.mrb[23].mxu1 }
 0x3ee   :  { %v4969_v9 = vpack.c.bf16 %v543_v3, %v538_v5 }
 0x3f2   :  { %v4976_v23 = vpop.eup %4688 }
 0x3f3   :  { %v1104_v7 = vsel %vm1037_vm5, %v4976_v23, 0.0  ;;  %v4986_v32 = vpop.eup %4690 }
 0x3f4   :  { %v1101_v33 = vsel %vm1037_vm5, %v4986_v32, 0.0  ;;  %v4990_v34 = vpop.eup %4692 }
 0x3f5   :  { %v1107_v35 = vsel %vm1037_vm5, %v4990_v34, 0.0 }
 0x400   :  { %1093 = vadd.xlane.f32.xlu1 %v1092_v21 }
 0x404   :  { %1099 = vadd.xlane.f32.xlu0 %v1098_v62 }
 0x408   :  { %1105 = vadd.xlane.f32.xlu0 %v1104_v7 }
 0x411   :  { %299 = vperm.xlu1 %4677, %v170_v20  }
 0x41e   :  { %304 = vperm.xlu0 %4676, %v171_v24   ;;  %v174_v24 = vld [vmem:[#allocation2 + $0x200] sm:$0xff] }
 0x435   :  { %1102 = vadd.xlane.f32.xlu1 %v1101_v33 }
 0x439   :  { %1108 = vadd.xlane.f32.xlu1 %v1107_v35 }
 0x44a   :  { %309 = vperm.xlu1 %4677, %v172_v36  }
 0x454   :  { %v1091_v38 = vpop.xlane.xlu1 %1090 }
 0x458   :  { %v1088_v4 = vpop.xlane.xlu0 %1087  ;;  %v290_v40 = vpop.permute.xlu1 %289 }
 0x459   :  { %v553_v44 = vadd.f32 %v4205_v48, %v290_v40  ;;  %4694 = vrcp.f32 %v1088_v4  ;;  %v175_v40 = vld [vmem:[#allocation2 + $0x208] sm:$0xff] }
 0x45c   :  { %v1097_v16 = vpop.xlane.xlu0 %1096  ;;  %v295_v54 = vpop.permute.xlu1 %294 }
 0x45d   :  { %4696 = vrcp.f32 %v1097_v16  ;;  %v558_v59 = vadd.f32 %v4965_v53, %v295_v54 }
 0x463   :  { %v4695_v0 = vpop.eup %4694 }
 0x464   :  { %v285_v43 = vpop.permute.xlu0 %284 }
 0x465   :  { %v548_v46 = vadd.f32 %v547_v49, %v285_v43  ;;  %v1118_v49 = vmul.f32 %v4695_v0, %v4955_v39  ;;  %v176_v43 = vld [vmem:[#allocation2 + $0x210] sm:$0xff] }
 0x467   :  { %v4519_v47 = vpack.c.bf16 %v553_v44, %v548_v46  ;;  %v4697_v1 = vpop.eup %4696  ;;  %v4541_v44 = vpack.c.bf16 %v176_v43, %v175_v40 }
 0x468   :  { %v1121_v6 = vmul.f32 %v4697_v1, %v4959_v42 }
 0x48d   :  { %v1094_v56 = vpop.xlane.xlu1 %1093 }
 0x48e   :  { %4698 = vrcp.f32 %v1094_v56 }
 0x48f   :  { %4700 = vrcp.f32 %v1091_v38 }
 0x491   :  { %v300_v57 = vpop.permute.xlu1 %299  ;;  %v1100_v48 = vpop.xlane.xlu0 %1099 }
 0x492   :  { %v563_v60 = vadd.f32 %v4963_v51, %v300_v57  ;;  %4702 = vrcp.f32 %v1100_v48 }
 0x494   :  { %v4525_v61 = vpack.c.bf16 %v563_v60, %v558_v59 }
 0x498   :  { %v4699_v3 = vpop.eup %4698 }
 0x499   :  { %v1120_v5 = vmul.f32 %v4699_v3, %v4685_v19  ;;  %v4701_v39 = vpop.eup %4700 }
 0x49a   :  { %v1119_v51 = vmul.f32 %v4701_v39, %v4951_v37 }
 0x49b   :  { %4240 = vmatprep.mubr.msk.f32.mxu0 %vm1037_vm5, %v1120_v5 }
 0x49c   :  { %4241 = vmatmul.mubr.msk.f32.vlgmr.msra.gmra.mrb[10].mxu0 %vm1037_vm5, %v1121_v6  ;;  %v4703_v42 = vpop.eup %4702 }
 0x49d   :  { %4506 = vmatpush3.bf16.xpose.msk.msra.mxu0 %vm4878_vm6, %v4888_v41  ;;  %4251 = vmatprep.mubr.msk.f32.mxu0 %vm1037_vm5, %v1118_v49  ;;  %v1122_v41 = vmul.f32 %v4703_v42, %v4972_v22 }
 0x49e   :  { %4509 = vmatprep.subr.msk.bf16.mxu0 %vm4878_vm6, %v4894_v45 }
 0x4a5   :  { %4512 = vmatpush3.bf16.xpose.msk.msra.mxu0 %vm4878_vm6, %v4894_v45  ;;  %v1106_v45 = vpop.xlane.xlu0 %1105 }
 0x4a6   :  { %4515 = vmatprep.subr.msk.bf16.mxu0 %vm4878_vm6, %v4969_v9  ;;  %4704 = vrcp.f32 %v1106_v45  ;;  %v3901_v45 = vld [vmem:[#allocation2 + $0x25c] ss:$0 sm:$0xff] }
 0x4a9   :  { %v305_v8 = vpop.permute.xlu0 %304 }
 0x4ac   :  { %4252 = vmatmul.mubr.msk.f32.vlgmr.msra.gmra.mrb[10].mxu0 %vm1037_vm5, %v1119_v51  ;;  %v3900_v51 = vld [vmem:[#allocation2 + $0x25b] ss:$0 sm:$0xff] }
 0x4ad   :  { %4518 = vmatpush3.bf16.xpose.msk.msra.mxu0 %vm4878_vm6, %v4969_v9  ;;  %4262 = vmatprep.mubr.msk.f32.mxu0 %vm1037_vm5, %v1122_v41  ;;  %v568_v9 = vadd.f32 %v4982_v26, %v305_v8  ;;  %v3899_v26 = vld [vmem:[#allocation2 + $0x258] ss:$0 sm:$0xff] }
 0x4ae   :  { %4521 = vmatprep.subr.msk.bf16.mxu0 %vm4878_vm6, %v4519_v47 }
 0x4b0   :  { %v4705_v14 = vpop.eup %4704 }
 0x4b1   :  { %v1124_v62 = vmul.f32 %v4705_v14, %v4976_v23  ;;  %v173_v23 = vld [vmem:[#allocation2 + $0x1f8] sm:$0xff]  ;;  %v180_v14 = vld [vmem:[#allocation2 + $0x230] sm:$0xff] }
 0x4b5   :  { %4524 = vmatpush3.bf16.xpose.msk.msra.mxu0 %vm4878_vm6, %v4519_v47 }
 0x4b6   :  { %4527 = vmatprep.subr.msk.bf16.mxu0 %vm4878_vm6, %v4525_v61 }
 0x4c2   :  { %v1103_v37 = vpop.xlane.xlu1 %1102 }
 0x4c3   :  { %4706 = vrcp.f32 %v1103_v37 }
 0x4c6   :  { %v1109_v53 = vpop.xlane.xlu1 %1108 }
 0x4c7   :  { %4708 = vrcp.f32 %v1109_v53 }
 0x4ca   :  { %v310_v10 = vpop.permute.xlu1 %309 }
 0x4cb   :  { %v573_v11 = vadd.f32 %v4980_v25, %v310_v10  ;;  %v4537_v25 = vpack.c.bf16 %v174_v24, %v173_v23  ;;  %v183_v23 = vld [vmem:[#allocation2 + $0x248] sm:$0xff]  ;;  %v184_v24 = vld [vmem:[#allocation2 + $0x250] sm:$0xff] }
 0x4cd   :  { %v4707_v19 = vpop.eup %4706  ;;  %v4531_v21 = vpack.c.bf16 %v573_v11, %v568_v9  ;;  %4538 = vmatprep.subr.bf16.mxu1 %v4537_v25  ;;  %v179_v11 = vld [vmem:[#allocation2 + $0x228] sm:$0xff] }
 0x4ce   :  { %v1123_v22 = vmul.f32 %v4707_v19, %v4986_v32  ;;  %4540 = vmatpush3.bf16.msra.mxu1 %v4537_v25  ;;  %v4557_v25 = vpack.c.bf16 %v184_v24, %v183_v23 }
 0x4cf   :  { %4542 = vmatprep.subr.bf16.mxu1 %v4541_v44 }
 0x4d0   :  { %4263 = vmatmul.mubr.msk.f32.vlgmr.msra.gmra.mrb[10].mxu0 %vm1037_vm5, %v1123_v22  ;;  %v4549_v22 = vpack.c.bf16 %v180_v14, %v179_v11 }
 0x4d1   :  { %4530 = vmatpush3.bf16.xpose.msk.msra.mxu0 %vm4878_vm6, %v4525_v61  ;;  %4273 = vmatprep.mubr.msk.f32.mxu0 %vm1037_vm5, %v1124_v62  ;;  %v4709_v7 = vpop.eup %4708  ;;  %v181_v62 = vld [vmem:[#allocation2 + $0x238] sm:$0xff] }
 0x4d2   :  { %4533 = vmatprep.subr.msk.bf16.mxu0 %vm4878_vm6, %v4531_v21  ;;  %v1125_v20 = vmul.f32 %v4709_v7, %v4990_v34  ;;  %4544 = vmatpush3.bf16.msra.mxu1 %v4541_v44  ;;  %v182_v7 = vld [vmem:[#allocation2 + $0x240] sm:$0xff] }
 0x4d9   :  { %4536 = vmatpush3.bf16.xpose.msk.msra.mxu0 %vm4878_vm6, %v4531_v21 }
 0x4e0   :  { %4274 = vmatmul.mubr.msk.f32.vlgmr.msra.gmra.mrb[10].mxu0 %vm1037_vm5, %v1125_v20  ;;  %v4553_v20 = vpack.c.bf16 %v182_v7, %v181_v62 }
 0x5b3   :  { %v4275_v27 = vpop.f32.mrb[10].mxu0 }
 0x5b4   :  { %v1507_v28 = vadd.f32 %v4275_v27, %v3899_v26  ;;  %v1491_v29 = vpop.f32.mrb[11].mxu0 }
 0x5b5   :  { %v1506_v30 = vadd.f32 %v3899_v26, %v1491_v29  ;;  %v3902_v26 = vld [vmem:[#allocation2 + $0x259] ss:$0 sm:$0xff] }
 0x5b6   :  { %v1509_v32 = vadd.f32 %v1507_v28, %v4827_v15  ;;  %v177_v15 = vld [vmem:[#allocation2 + $0x218] sm:$0xff] }
 0x5b7   :  { %v1508_v33 = vadd.f32 %v1506_v30, %v4829_v17  ;;  %v178_v17 = vld [vmem:[#allocation2 + $0x220] sm:$0xff] }
 0x5b8   :  { %v1515_v35 = vsel %vm312_vm2, %v1509_v32, 0.0  ;;  %v1511_v38 = vmul.f32 %v1509_v32, %v1509_v32  ;;  %v4545_v46 = vpack.c.bf16 %v178_v17, %v177_v15 }
 0x5b9   :  { %1516 = vadd.xlane.f32.xlu1 %v1515_v35  ;;  %v1512_v34 = vsel %vm312_vm2, %v1508_v33, 0.0  ;;  %v1510_v36 = vmul.f32 %v1508_v33, %v1508_v33  ;;  %v3905_v35 = vld [vmem:[#allocation2 + $0x25a] ss:$0 sm:$0xff] }
 0x5ba   :  { %1513 = vadd.xlane.f32.xlu0 %v1512_v34  ;;  %v1521_v16 = vsel %vm312_vm2, %v1511_v38, 0.0  ;;  %4546 = vmatprep.subr.bf16.mxu1 %v4545_v46 }
 0x5bb   :  { %v1518_v4 = vsel %vm312_vm2, %v1510_v36, 0.0 }
 0x5be   :  { %1519 = vadd.xlane.f32.xlu0 %v1518_v4 }
 0x5c2   :  { %1522 = vadd.xlane.f32.xlu0 %v1521_v16 }
 0x646   :  { %v1517_v56 = vpop.xlane.xlu1 %1516 }
 0x647   :  { %v1514_v47 = vpop.xlane.xlu0 %1513  ;;  %v1526_v59 = vmul.f32 0.03125, %v1517_v56  ;;  %v1798_v56 = vld [vmem:[#allocation2 + $0x340] sm:$0xff] }
 0x648   :  { %v1525_v54 = vmul.f32 0.03125, %v1514_v47 }
 0x649   :  { %v1530_v3 = vmul.f32 %v1526_v59, %v1526_v59  ;;  %v1534_v37 = vsub.f32 %v1509_v32, %v1526_v59  ;;  %v1794_v59 = vld [vmem:[#allocation2 + $0x320] sm:$0xff] }
 0x64a   :  { %v1529_v60 = vmul.f32 %v1525_v54, %v1525_v54  ;;  %v1533_v39 = vsub.f32 %v1508_v33, %v1525_v54  ;;  %v1795_v54 = vld [vmem:[#allocation2 + $0x328] sm:$0xff] }
 0x64b   :  { %v1520_v57 = vpop.xlane.xlu0 %1519 }
 0x64c   :  { %v1527_v61 = vmul.f32 0.03125, %v1520_v57  ;;  %v1796_v57 = vld [vmem:[#allocation2 + $0x330] sm:$0xff] }
 0x64e   :  { %v1531_v0 = vsub.f32 %v1527_v61, %v1529_v60  ;;  %v1797_v60 = vld [vmem:[#allocation2 + $0x338] sm:$0xff]  ;;  %v1799_v61 = vld [vmem:[#allocation2 + $0x348] sm:$0xff] }
 0x64f   :  { %v1523_v1 = vpop.xlane.xlu0 %1522 }
 0x650   :  { %v1535_v5 = vadd.f32 1e-05, %v1531_v0  ;;  %v1528_v6 = vmul.f32 0.03125, %v1523_v1  ;;  %v1800_v0 = vld [vmem:[#allocation2 + $0x350] sm:$0xff]  ;;  %v1770_v1 = vld [vmem:[#allocation2 + $0x260] sm:$0xff] }
 0x652   :  { %4710 = vrsqrt.f32 %v1535_v5  ;;  %v1532_v48 = vsub.f32 %v1528_v6, %v1530_v3 }
 0x654   :  { %v1536_v49 = vadd.f32 1e-05, %v1532_v48 }
 0x656   :  { %4712 = vrsqrt.f32 %v1536_v49 }
 0x65c   :  { %v4711_v42 = vpop.eup %4710 }
 0x65d   :  { %v1539_v41 = vmul.f32 %v4711_v42, %v1533_v39 }
 0x65f   :  { %v1545_v53 = vmul.f32 %v3900_v51, %v1539_v41 }
 0x660   :  { %v4713_v8 = vpop.eup %4712 }
 0x661   :  { %v1540_v10 = vmul.f32 %v4713_v8, %v1534_v37  ;;  %v1551_v9 = vadd.f32 %v3901_v45, %v1545_v53 }
 0x663   :  { %v1546_v19 = vmul.f32 %v3900_v51, %v1540_v10  ;;  %4284 = vmatprep.mubr.msk.f32.mxu1 %vm312_vm2, %v1551_v9 }
 0x665   :  { %v1552_v21 = vadd.f32 %v3901_v45, %v1546_v19  ;;  %v3908_v19 = vld [vmem:[#allocation2 + $0x25d] ss:$0 sm:$0xff] }
 0x667   :  { %4285 = vmatmul.mubr.msk.f32.vlgmr.msra.gmra.mrb[24].mxu1 %vm312_vm2, %v1552_v21 }
 0x668   :  { %4548 = vmatpush3.bf16.msra.mxu1 %v4545_v46 }
 0x669   :  { %4550 = vmatprep.subr.bf16.mxu1 %v4549_v22 }
 0x66c   :  { %4552 = vmatpush3.bf16.msra.mxu1 %v4549_v22 }
 0x66d   :  { %4554 = vmatprep.subr.bf16.mxu1 %v4553_v20 }
 0x670   :  { %4556 = vmatpush3.bf16.msra.mxu1 %v4553_v20  ;;  %v3909_v20 = vld [vmem:[#allocation2 + $0x25e] ss:$0 sm:$0xff] }
 0x671   :  { %4558 = vmatprep.subr.bf16.mxu1 %v4557_v25 }
 0x674   :  { %4560 = vmatpush3.bf16.msra.mxu1 %v4557_v25 }
 0x73a   :  { %v4286_v27 = vpop.f32.mrb[24].mxu1 }
 0x73b   :  { %v1635_v28 = vadd.f32 %v4286_v27, %v3902_v26  ;;  %v1629_v29 = vpop.f32.mrb[25].mxu1  ;;  %v1771_v27 = vld [vmem:[#allocation2 + $0x268] sm:$0xff] }
 0x73c   :  { %v1630_v30 = vadd.f32 %v3902_v26, %v1629_v29  ;;  %v1773_v29 = vld [vmem:[#allocation2 + $0x278] sm:$0xff] }
 0x73d   :  { %v1639_v33 = vmax.f32 %v1635_v28, 0.0  ;;  %v1772_v28 = vld [vmem:[#allocation2 + $0x270] sm:$0xff] }
 0x73e   :  { %v1638_v32 = vmax.f32 %v1630_v30, 0.0  ;;  %v1774_v30 = vld [vmem:[#allocation2 + $0x280] sm:$0xff] }
 0x740   :  { %4303 = vmatprep.mubr.msk.f32.mxu1 %vm1644_vm7, %v1638_v32  ;;  %v1775_v32 = vld [vmem:[#allocation2 + $0x288] sm:$0xff] }
 0x741   :  { %4304 = vmatmul.mubr.msk.f32.vlgmr.msra.gmra.mrb[26].mxu1 %vm1644_vm7, %v1639_v33  ;;  %v1776_v33 = vld [vmem:[#allocation2 + $0x290] sm:$0xff] }
 0x742   :  { %4310 = vmatprep.mubr.msk.f32.mxu1 %vm312_vm2, %v1770_v1 }
 0x814   :  { %v4305_v34 = vpop.f32.mrb[26].mxu1 }
 0x815   :  { %v1723_v36 = vadd.f32 %v4305_v34, %v3905_v35  ;;  %v1717_v4 = vpop.f32.mrb[27].mxu1  ;;  %v1779_v34 = vld [vmem:[#allocation2 + $0x2a8] sm:$0xff] }
 0x816   :  { %v1718_v38 = vadd.f32 %v3905_v35, %v1717_v4  ;;  %v1778_v35 = vld [vmem:[#allocation2 + $0x2a0] sm:$0xff]  ;;  %v1781_v4 = vld [vmem:[#allocation2 + $0x2b8] sm:$0xff] }
 0x817   :  { %v1727_v16 = vadd.f32 %v1723_v36, %v1552_v21  ;;  %v1780_v36 = vld [vmem:[#allocation2 + $0x2b0] sm:$0xff] }
 0x818   :  { %v1726_v40 = vadd.f32 %v1718_v38, %v1551_v9  ;;  %v1782_v38 = vld [vmem:[#allocation2 + $0x2c0] sm:$0xff] }
 0x819   :  { %v1733_v43 = vsel %vm312_vm2, %v1727_v16, 0.0  ;;  %v1729_v44 = vmul.f32 %v1727_v16, %v1727_v16 }
 0x81a   :  { %1734 = vadd.xlane.f32.xlu0 %v1733_v43  ;;  %v1730_v17 = vsel %vm312_vm2, %v1726_v40, 0.0  ;;  %v1728_v46 = vmul.f32 %v1726_v40, %v1726_v40  ;;  %v1785_v43 = vld [vmem:[#allocation2 + $0x2d8] sm:$0xff] }
 0x81b   :  { %v1739_v15 = vsel %vm312_vm2, %v1729_v44, 0.0 }
 0x81c   :  { %1740 = vadd.xlane.f32.xlu1 %v1739_v15  ;;  %v1736_v47 = vsel %vm312_vm2, %v1728_v46, 0.0 }
 0x81e   :  { %1731 = vadd.xlane.f32.xlu0 %v1730_v17 }
 0x822   :  { %1737 = vadd.xlane.f32.xlu0 %v1736_v47 }
 0x82d   :  { %1844 = vperm.xlu1 %4677, %v1795_v54  }
 0x831   :  { %1859 = vperm.xlu1 %4677, %v1798_v56  }
 0x835   :  { %1849 = vperm.xlu1 %4677, %v1796_v57  }
 0x838   :  { %1839 = vperm.xlu0 %4676, %v1794_v59  }
 0x839   :  { %1854 = vperm.xlu1 %4677, %v1797_v60  }
 0x83c   :  { %1864 = vperm.xlu0 %4676, %v1799_v61  }
 0x83d   :  { %1869 = vperm.xlu1 %4677, %v1800_v0  }
 0x8a7   :  { %v1735_v3 = vpop.xlane.xlu0 %1734 }
 0x8a8   :  { %v1743_v5 = vmul.f32 0.03125, %v1735_v3 }
 0x8a9   :  { %v1741_v6 = vpop.xlane.xlu1 %1740 }
 0x8aa   :  { %v1747_v48 = vmul.f32 %v1743_v5, %v1743_v5  ;;  %v1745_v49 = vmul.f32 0.03125, %v1741_v6  ;;  %v1751_v11 = vsub.f32 %v1727_v16, %v1743_v5  ;;  %v1783_v16 = vld [vmem:[#allocation2 + $0x2c8] sm:$0xff] }
 0x8ab   :  { %v1732_v39 = vpop.xlane.xlu0 %1731 }
 0x8ac   :  { %v1749_v42 = vsub.f32 %v1745_v49, %v1747_v48  ;;  %v1742_v51 = vmul.f32 0.03125, %v1732_v39 }
 0x8ad   :  { %v1845_v44 = vpop.permute.xlu1 %1844 }
 0x8ae   :  { %v1753_v41 = vadd.f32 1e-05, %v1749_v42  ;;  %v1746_v37 = vmul.f32 %v1742_v51, %v1742_v51  ;;  %v1750_v21 = vsub.f32 %v1726_v40, %v1742_v51  ;;  %v1784_v40 = vld [vmem:[#allocation2 + $0x2d0] sm:$0xff] }
 0x8af   :  { %v1738_v45 = vpop.xlane.xlu0 %1737 }
 0x8b0   :  { %4714 = vrsqrt.f32 %v1753_v41  ;;  %v1744_v53 = vmul.f32 0.03125, %v1738_v45 }
 0x8b1   :  { %v1860_v15 = vpop.permute.xlu1 %1859 }
 0x8b2   :  { %v1748_v8 = vsub.f32 %v1744_v53, %v1746_v37 }
 0x8b4   :  { %v1752_v10 = vadd.f32 1e-05, %v1748_v8  ;;  %v1807_v8 = vld [vmem:[#allocation2 + $0x388] sm:$0xff] }
 0x8b5   :  { %v1850_v57 = vpop.permute.xlu1 %1849 }
 0x8b6   :  { %4716 = vrsqrt.f32 %v1752_v10  ;;  %v1801_v10 = vld [vmem:[#allocation2 + $0x358] sm:$0xff] }
 0x8b7   :  { %v1840_v46 = vpop.permute.xlu0 %1839 }
 0x8b9   :  { %v1855_v3 = vpop.permute.xlu1 %1854 }
 0x8ba   :  { %v4715_v9 = vpop.eup %4714 }
 0x8bb   :  { %v1757_v14 = vmul.f32 %v4715_v9, %v1751_v11  ;;  %v1865_v6 = vpop.permute.xlu0 %1864  ;;  %v1809_v9 = vld [vmem:[#allocation2 + $0x398] sm:$0xff] }
 0x8bd   :  { %v1763_v7 = vmul.f32 %v3908_v19, %v1757_v14  ;;  %v1806_v14 = vld [vmem:[#allocation2 + $0x380] sm:$0xff] }
 0x8bf   :  { %v5057_v25 = vadd.f32 %v3909_v20, %v1763_v7  ;;  %v1805_v7 = vld [vmem:[#allocation2 + $0x378] sm:$0xff] }
 0x8c0   :  { %v4717_v22 = vpop.eup %4716 }
 0x8c1   :  { %v1756_v62 = vmul.f32 %v4717_v22, %v1750_v21  ;;  %v1802_v21 = vld [vmem:[#allocation2 + $0x360] sm:$0xff]  ;;  %v1808_v22 = vld [vmem:[#allocation2 + $0x390] sm:$0xff] }
 0x8c3   :  { %v1762_v23 = vmul.f32 %v3908_v19, %v1756_v62 }
 0x8c5   :  { %v5055_v24 = vadd.f32 %v3909_v20, %v1762_v23  ;;  %v1803_v20 = vld [vmem:[#allocation2 + $0x368] sm:$0xff]  ;;  %v1804_v23 = vld [vmem:[#allocation2 + $0x370] sm:$0xff] }
 0x8c7   :  { %v4561_v26 = vpack.c.bf16 %v5057_v25, %v5055_v24 }
 0x8c9   :  { %4563 = vmatprep.subr.msk.bf16.mxu1 %vm4833_vm3, %v4561_v26 }
 0x8ca   :  { %4566 = vmatpush3.bf16.xpose.msk.msra.mxu1 %vm4833_vm3, %v4561_v26  ;;  %v1786_v26 = vld [vmem:[#allocation2 + $0x2e0] sm:$0xff] }
 0x8d1   :  { %4311 = vmatmul.mubr.msk.f32.vlgmr.msra.gmra.mrb[28].mxu1 %vm312_vm2, %v1771_v27  ;;  %v1787_v27 = vld [vmem:[#allocation2 + $0x2e8] sm:$0xff] }
 0x8d2   :  { %4313 = vmatprep.mubr.msk.f32.mxu1 %vm312_vm2, %v1772_v28  ;;  %v1788_v28 = vld [vmem:[#allocation2 + $0x2f0] sm:$0xff] }
 0x8d5   :  { %4314 = vmatmul.mubr.msk.f32.gmra.mrb[30].mxu1 %vm312_vm2, %v1773_v29  ;;  %v1789_v29 = vld [vmem:[#allocation2 + $0x2f8] sm:$0xff] }
 0x8d6   :  { %4316 = vmatprep.mubr.msk.f32.mxu1 %vm312_vm2, %v1774_v30  ;;  %v1870_v30 = vpop.permute.xlu1 %1869 }
 0x8d9   :  { %4317 = vmatmul.mubr.msk.f32.gmra.mrb[32].mxu1 %vm312_vm2, %v1775_v32 }
 0x8da   :  { %4319 = vmatprep.mubr.msk.f32.mxu1 %vm312_vm2, %v1776_v33 }
 0x8dd   :  { %4320 = vmatmul.mubr.msk.f32.gmra.mrb[34].mxu1 %vm312_vm2, %v1777_v18 }
 0x8de   :  { %4322 = vmatprep.mubr.msk.f32.mxu1 %vm312_vm2, %v1778_v35 }
 0x8e1   :  { %4323 = vmatmul.mubr.msk.f32.gmra.mrb[36].mxu1 %vm312_vm2, %v1779_v34 }
 0x8e2   :  { %4325 = vmatprep.mubr.msk.f32.mxu1 %vm312_vm2, %v1780_v36 }
 0x8e5   :  { %4326 = vmatmul.mubr.msk.f32.gmra.mrb[38].mxu1 %vm312_vm2, %v1781_v4 }
 0x8e6   :  { %4328 = vmatprep.mubr.msk.f32.mxu1 %vm312_vm2, %v1782_v38 }
 0x8e9   :  { %4329 = vmatmul.mubr.msk.f32.gmra.mrb[40].mxu1 %vm312_vm2, %v1783_v16 }
 0x8ea   :  { %4331 = vmatprep.mubr.msk.f32.mxu1 %vm312_vm2, %v1784_v40 }
 0x8ed   :  { %4332 = vmatmul.mubr.msk.f32.gmra.mrb[42].mxu1 %vm312_vm2, %v1785_v43 }
 0x8ee   :  { %4334 = vmatprep.mubr.msk.f32.mxu1 %vm312_vm2, %v1786_v26 }
 0x8f1   :  { %4335 = vmatmul.mubr.msk.f32.gmra.mrb[44].mxu1 %vm312_vm2, %v1787_v27  ;;  %v1792_v27 = vld [vmem:[#allocation2 + $0x310] sm:$0xff] }
 0x8f2   :  { %4337 = vmatprep.mubr.msk.f32.mxu1 %vm312_vm2, %v1788_v28  ;;  %v1793_v28 = vld [vmem:[#allocation2 + $0x318] sm:$0xff] }
 0x8f5   :  { %4338 = vmatmul.mubr.msk.f32.gmra.mrb[46].mxu1 %vm312_vm2, %v1789_v29 }
 0x9a4   :  { %v4312_v17 = vpop.f32.mrb[28].mxu1 }
 0x9a5   :  { %v2107_v47 = vadd.f32 %v4312_v17, %v1845_v44  ;;  %v2101_v54 = vpop.f32.mrb[29].mxu1 }
 0x9a6   :  { %v2102_v56 = vadd.f32 %v2101_v54, %v1840_v46 }
 0x9a7   :  { %2333 = vxpose.xlu1.b32.start.end [1/1] (short) (narrow) %v2107_v47, 16 }
 0x9a8   :  { %v4315_v59 = vpop.f32.mrb[30].mxu1  ;;  %2220 = vxpose.xlu0.b32.start.end [1/1] (short) (narrow) %v2102_v56, 16 }
 0x9a9   :  { %v2111_v60 = vpop.f32.mrb[31].mxu1  ;;  %v2117_v48 = vadd.f32 %v4315_v59, %v1855_v3 }
 0x9aa   :  { %v2112_v61 = vadd.f32 %v2111_v60, %v1850_v57 }
 0x9ac   :  { %v4318_v0 = vpop.f32.mrb[32].mxu1  ;;  %2446 = vxpose.xlu1.b32.start.end [1/1] (short) (narrow) %v2112_v61, 16 }
 0x9ad   :  { %v2121_v1 = vpop.f32.mrb[33].mxu1  ;;  %v2127_v49 = vadd.f32 %v4318_v0, %v1865_v6 }
 0x9ae   :  { %v2122_v5 = vadd.f32 %v2121_v1, %v1860_v15 }
 0x9b0   :  { %v4321_v39 = vpop.f32.mrb[34].mxu1  ;;  %4346 = vmatprep.subr.mxu0 %v2122_v5 }
 0x9b1   :  { %v2131_v42 = vpop.f32.mrb[35].mxu1  ;;  %4347 = vmatpush3.msra.mxu0 %v2122_v5  ;;  %2559 = vxpose.xlu1.b32.start.end [1/1] (short) (narrow) %v2117_v48, 16 }
 0x9b2   :  { %4351 = vmatprep.subr.mxu0 %v2127_v49  ;;  %v2132_v34 = vadd.f32 %v2131_v42, %v1870_v30 }
 0x9b4   :  { %v5080_v51 = vpop.f32.mrb[36].mxu1 }
 0x9b5   :  { %v5082_v41 = vpop.f32.mrb[37].mxu1 }
 0x9b8   :  { %v5084_v45 = vpop.f32.mrb[38].mxu1 }
 0x9b9   :  { %v5086_v37 = vpop.f32.mrb[39].mxu1 }
 0x9bc   :  { %v4330_v53 = vpop.f32.mrb[40].mxu1 }
 0x9bd   :  { %v2161_v11 = vpop.f32.mrb[41].mxu1 }
 0x9c0   :  { %v4333_v19 = vpop.f32.mrb[42].mxu1 }
 0x9c1   :  { %v2171_v62 = vpop.f32.mrb[43].mxu1 }
 0x9d3   :  { %1904 = vperm.xlu1 %4677, %v1807_v8  }
 0x9d5   :  { %1874 = vperm.xlu0 %4676, %v1801_v10  }
 0x9d7   :  { %1914 = vperm.xlu1 %4677, %v1809_v9  }
 0x9d9   :  { %1899 = vperm.xlu0 %4676, %v1806_v14  }
 0x9db   :  { %1879 = vperm.xlu1 %4677, %v1802_v21  }
 0x9dd   :  { %1909 = vperm.xlu0 %4676, %v1808_v22  }
 0x9df   :  { %1894 = vperm.xlu1 %4677, %v1805_v7  }
 0x9e1   :  { %1884 = vperm.xlu0 %4676, %v1803_v20   ;;  %v1811_v20 = vld [vmem:[#allocation2 + $0x3a8] sm:$0xff] }
 0x9e5   :  { %1889 = vperm.xlu0 %4676, %v1804_v23   ;;  %v4336_v23 = vpop.f32.mrb[44].mxu1 }
 0x9e6   :  { %v2181_v26 = vpop.f32.mrb[45].mxu1 }
 0xa27   :  { %v2349_v32 = vpop.trf.xlu1 }
 0xa28   :  { %v2236_v33 = vpop.trf.xlu0 }
 0xa29   :  { %4348 = vmatprep.mubr.msk.f32.mxu0 %vm608_vm4, %v2236_v33 }
 0xa2b   :  { %v2350_v18 = vpop.trf.xlu1 }
 0xa2c   :  { %v2237_v35 = vpop.trf.xlu0 }
 0xa2d   :  { %4349 = vmatmul.mubr.msk.f32.vlgmr.msra.gmra.mrb[12].mxu0 %vm608_vm4, %v2237_v35  ;;  %v5143_v35 = vpop.f32.mrb[46].mxu1 }
 0xa2e   :  { %4352 = vmatpush3.msra.mxu0 %v2127_v49  ;;  %4353 = vmatprep.mubr.msk.f32.mxu0 %vm608_vm4, %v2349_v32 }
 0xa2f   :  { %4356 = vmatprep.subr.mxu0 %v2132_v34  ;;  %v2462_v36 = vpop.trf.xlu1 }
 0xa31   :  { %4354 = vmatmul.mubr.msk.f32.vlgmr.msra.gmra.mrb[14].mxu0 %vm608_vm4, %v2350_v18 }
 0xa32   :  { %4357 = vmatpush3.msra.mxu0 %v2132_v34  ;;  %4358 = vmatprep.mubr.msk.f32.mxu0 %vm608_vm4, %v2462_v36  ;;  %v1812_v34 = vld [vmem:[#allocation2 + $0x3b0] sm:$0xff]  ;;  %v2191_v36 = vpop.f32.mrb[47].mxu1 }
 0xa33   :  { %v2463_v4 = vpop.trf.xlu1 }
 0xa35   :  { %4359 = vmatmul.mubr.msk.f32.vlgmr.msra.gmra.mrb[16].mxu0 %vm608_vm4, %v2463_v4 }
 0xa37   :  { %v2575_v38 = vpop.trf.xlu1 }
 0xa38   :  { %4363 = vmatprep.mubr.msk.f32.mxu0 %vm608_vm4, %v2575_v38 }
 0xa3b   :  { %v2576_v16 = vpop.trf.xlu1 }
 0xa52   :  { %v1905_v40 = vpop.permute.xlu1 %1904 }
 0xa53   :  { %v2167_v46 = vadd.f32 %v4330_v53, %v1905_v40 }
 0xa54   :  { %v1875_v43 = vpop.permute.xlu0 %1874 }
 0xa55   :  { %v2137_v44 = vadd.f32 %v4321_v39, %v1875_v43 }
 0xa56   :  { %v1915_v15 = vpop.permute.xlu1 %1914 }
 0xa57   :  { %4361 = vmatprep.subr.mxu0 %v2137_v44  ;;  %v2177_v59 = vadd.f32 %v4333_v19, %v1915_v15 }
 0xa58   :  { %4362 = vmatpush3.msra.mxu0 %v2137_v44  ;;  %v1900_v17 = vpop.permute.xlu0 %1899 }
 0xa59   :  { %v2162_v47 = vadd.f32 %v2161_v11, %v1900_v17  ;;  %4364 = vmatmul.mubr.msk.f32.vlgmr.msra.gmra.mrb[18].mxu0 %vm608_vm4, %v2576_v16 }
 0xa5a   :  { %v1880_v56 = vpop.permute.xlu1 %1879 }
 0xa5b   :  { %v4567_v54 = vpack.c.bf16 %v2167_v46, %v2162_v47  ;;  %v2142_v1 = vadd.f32 %v5082_v41, %v1880_v56  ;;  %v1791_v41 = vld [vmem:[#allocation2 + $0x308] sm:$0xff] }
 0xa5c   :  { %v1910_v57 = vpop.permute.xlu0 %1909 }
 0xa5d   :  { %v2172_v60 = vadd.f32 %v2171_v62, %v1910_v57  ;;  %4569 = vmatprep.subr.msk.bf16.mxu0 %vm4878_vm6, %v4567_v54 }
 0xa5e   :  { %v1895_v5 = vpop.permute.xlu1 %1894 }
 0xa5f   :  { %v4573_v61 = vpack.c.bf16 %v2177_v59, %v2172_v60  ;;  %4572 = vmatpush3.bf16.xpose.msk.msra.mxu0 %vm4878_vm6, %v4567_v54  ;;  %v2157_v49 = vadd.f32 %v5084_v45, %v1895_v5 }
 0xa60   :  { %v1885_v0 = vpop.permute.xlu0 %1884 }
 0xa61   :  { %v2147_v3 = vadd.f32 %v5080_v51, %v1885_v0  ;;  %4575 = vmatprep.subr.msk.bf16.mxu0 %vm4878_vm6, %v4573_v61  ;;  %v1790_v51 = vld [vmem:[#allocation2 + $0x300] sm:$0xff] }
 0xa62   :  { %4340 = vmatprep.mubr.msk.f32.mxu1 %vm312_vm2, %v1790_v51 }
 0xa63   :  { %v5108_v6 = vpack.c.bf16 %v2147_v3, %v2142_v1  ;;  %4341 = vmatmul.mubr.msk.f32.gmra.mrb[48].mxu1 %vm312_vm2, %v1791_v41 }
 0xa64   :  { %v1890_v48 = vpop.permute.xlu0 %1889  ;;  %4343 = vmatprep.mubr.msk.f32.mxu1 %vm312_vm2, %v1792_v27 }
 0xa65   :  { %v2152_v39 = vadd.f32 %v5086_v37, %v1890_v48 }
 0xa67   :  { %v5112_v42 = vpack.c.bf16 %v2157_v49, %v2152_v39  ;;  %4578 = vmatpush3.bf16.xpose.msk.msra.mxu0 %vm4878_vm6, %v4573_v61  ;;  %4344 = vmatmul.mubr.msk.f32.gmra.mrb[50].mxu1 %vm312_vm2, %v1793_v28  ;;  %v1817_v28 = vld [vmem:[#allocation2 + $0x3d8] sm:$0xff] }
 0xa68   :  { %4581 = vmatprep.subr.msk.bf16.mxu0 %vm4878_vm6, %v5108_v6 }
 0xb00   :  { %v4350_v53 = vpop.f32.mrb[12].mxu0 }
 0xb01   :  { %v2673_v45 = vadd.f32 %v4350_v53, %v4905_v50  ;;  %v2324_v8 = vpop.f32.mrb[13].mxu0  ;;  %v1813_v53 = vld [vmem:[#allocation2 + $0x3b8] sm:$0xff] }
 0xb02   :  { %v2672_v37 = vadd.f32 %v2324_v8, %v4907_v52 }
 0xb03   :  { %v2683_v10 = vsel %vm1037_vm5, %v2673_v45, -inf }
 0xb04   :  { %2684 = vmax.xlane.f32.xlu1 %v2683_v10  ;;  %v4355_v9 = vpop.f32.mrb[14].mxu0  ;;  %v2680_v21 = vsel %vm1037_vm5, %v2672_v37, -inf  ;;  %v1815_v10 = vld [vmem:[#allocation2 + $0x3c8] sm:$0xff] }
 0xb05   :  { %v2675_v11 = vadd.f32 %v4355_v9, %v4910_v55  ;;  %v2437_v14 = vpop.f32.mrb[15].mxu0 }
 0xb06   :  { %v2674_v19 = vadd.f32 %v2437_v14, %v4914_v58  ;;  %v1810_v58 = vld [vmem:[#allocation2 + $0x3a0] sm:$0xff] }
 0xb07   :  { %v2689_v22 = vsel %vm1037_vm5, %v2675_v11, -inf }
 0xb08   :  { %2681 = vmax.xlane.f32.xlu1 %v2680_v21  ;;  %2690 = vmax.xlane.f32.xlu0 %v2689_v22  ;;  %v4360_v62 = vpop.f32.mrb[16].mxu0  ;;  %v2686_v7 = vsel %vm1037_vm5, %v2674_v19, -inf }
 0xb09   :  { %v5129_v50 = vadd.f32 %v4360_v62, %v4920_v63  ;;  %v2550_v52 = vpop.f32.mrb[17].mxu0 }
 0xb0a   :  { %v2676_v30 = vadd.f32 %v2550_v52, %v4924_v2 }
 0xb0b   :  { %v2695_v55 = vsel %vm1037_vm5, %v5129_v50, -inf }
 0xb0c   :  { %2687 = vmax.xlane.f32.xlu1 %v2686_v7  ;;  %v2692_v32 = vsel %vm1037_vm5, %v2676_v30, -inf }
 0xb10   :  { %2696 = vmax.xlane.f32.xlu1 %v2695_v55 }
 0xb1e   :  { %1924 = vperm.xlu0 %4676, %v1811_v20  }
 0xb21   :  { %1919 = vperm.xlu1 %4677, %v1810_v58  }
 0xb2c   :  { %v4365_v63 = vpop.f32.mrb[18].mxu0 }
 0xb2d   :  { %v2663_v29 = vpop.f32.mrb[19].mxu0  ;;  %v5139_v33 = vadd.f32 %v4365_v63, %v4940_v12 }
 0xb2e   :  { %v5146_v4 = vadd.f32 %v2663_v29, %v4942_v13 }
 0xb2f   :  { %v2701_v18 = vsel %vm1037_vm5, %v5139_v33, -inf }
 0xb30   :  { %v2698_v2 = vsel %vm1037_vm5, %v5146_v4, -inf }
 0xb36   :  { %v4342_v8 = vpop.f32.mrb[48].mxu1 }
 0xb3d   :  { %2693 = vmax.xlane.f32.xlu0 %v2692_v32 }
 0xb45   :  { %2702 = vmax.xlane.f32.xlu1 %v2701_v18 }
 0xb53   :  { %1929 = vperm.xlu0 %4676, %v1812_v34   ;;  %v1816_v34 = vld [vmem:[#allocation2 + $0x3d0] sm:$0xff] }
 0xb72   :  { %2699 = vmax.xlane.f32.xlu0 %v2698_v2 }
 0xb91   :  { %v2685_v38 = vpop.xlane.xlu1 %2684 }
 0xb92   :  { %v2705_v16 = vsub.f32 %v2673_v45, %v2685_v38  ;;  %v1814_v45 = vld [vmem:[#allocation2 + $0x3c0] sm:$0xff] }
 0xb94   :  { %v2714_v12 = vmul.f32 1.442695, %v2705_v16 }
 0xb95   :  { %v2682_v40 = vpop.xlane.xlu1 %2681  ;;  %v2691_v43 = vpop.xlane.xlu0 %2690 }
 0xb96   :  { %4718 = vpow2.f32 %v2714_v12  ;;  %v2704_v44 = vsub.f32 %v2672_v37, %v2682_v40  ;;  %v2707_v15 = vsub.f32 %v2675_v11, %v2691_v43  ;;  %v2201_v37 = vpop.f32.mrb[49].mxu1 }
 0xb97   :  { %v5182_v63 = vpop.f32.mrb[50].mxu1 }
 0xb98   :  { %v2712_v17 = vmul.f32 1.442695, %v2704_v44  ;;  %v2718_v46 = vmul.f32 1.442695, %v2707_v15 }
 0xb99   :  { %v2688_v47 = vpop.xlane.xlu1 %2687 }
 0xb9a   :  { %4720 = vpow2.f32 %v2712_v17  ;;  %v2706_v54 = vsub.f32 %v2674_v19, %v2688_v47 }
 0xb9b   :  { %4722 = vpow2.f32 %v2718_v46 }
 0xb9c   :  { %v2716_v13 = vmul.f32 1.442695, %v2706_v54 }
 0xb9d   :  { %v2697_v56 = vpop.xlane.xlu1 %2696  ;;  %v1925_v57 = vpop.permute.xlu0 %1924 }
 0xb9e   :  { %4724 = vpow2.f32 %v2716_v13  ;;  %v2187_v59 = vadd.f32 %v4336_v23, %v1925_v57  ;;  %v2709_v9 = vsub.f32 %v5129_v50, %v2697_v56 }
 0xba0   :  { %v5150_v60 = vpop.eup %4718  ;;  %v2722_v21 = vmul.f32 1.442695, %v2709_v9 }
 0xba1   :  { %v1920_v61 = vpop.permute.xlu1 %1919  ;;  %v2731_v0 = vsel %vm1037_vm5, %v5150_v60, 0.0 }
 0xba2   :  { %v2182_v1 = vadd.f32 %v2181_v26, %v1920_v61  ;;  %2732 = vadd.xlane.f32.xlu0 %v2731_v0 }
 0xba4   :  { %v5154_v3 = vpop.eup %4720  ;;  %v5156_v5 = vpack.c.bf16 %v2187_v59, %v2182_v1 }
 0xba5   :  { %v5158_v48 = vpop.eup %4722  ;;  %v2728_v49 = vsel %vm1037_vm5, %v5154_v3, 0.0 }
 0xba6   :  { %2729 = vadd.xlane.f32.xlu1 %v2728_v49  ;;  %v2737_v39 = vsel %vm1037_vm5, %v5158_v48, 0.0 }
 0xba7   :  { %2738 = vadd.xlane.f32.xlu0 %v2737_v39 }
 0xba8   :  { %v5164_v51 = vpop.eup %4724 }
 0xba9   :  { %v2734_v41 = vsel %vm1037_vm5, %v5164_v51, 0.0 }
 0xbaa   :  { %2735 = vadd.xlane.f32.xlu1 %v2734_v41 }
 0xbbb   :  { %1934 = vperm.xlu1 %4677, %v1813_v53  }
 0xbbd   :  { %1939 = vperm.xlu0 %4676, %v1814_v45  }
 0xbc1   :  { %1944 = vperm.xlu0 %4676, %v1815_v10  }
 0xbca   :  { %v2694_v11 = vpop.xlane.xlu0 %2693 }
 0xbcb   :  { %v2708_v14 = vsub.f32 %v2676_v30, %v2694_v11  ;;  %v1818_v11 = vld [vmem:[#allocation2 + $0x3e0] sm:$0xff] }
 0xbcd   :  { %v2720_v19 = vmul.f32 1.442695, %v2708_v14  ;;  %v1819_v14 = vld [vmem:[#allocation2 + $0x3e8] sm:$0xff] }
 0xbcf   :  { %4726 = vpow2.f32 %v2720_v19  ;;  %v4615_v19 = vpack.c.bf16 %v1819_v14, %v1818_v11  ;;  %v3418_v14 = vld [vmem:[#allocation2 + $0x448] sm:$0x3] }
 0xbd0   :  { %4728 = vpow2.f32 %v2722_v21  ;;  %v3968_v21 = vld [vmem:[#allocation2 + $0x440] ss:$0 sm:$0xff] }
 0xbd1   :  { %4616 = vmatprep.subr.bf16.mxu1 %v4615_v19 }
 0xbd2   :  { %v2703_v22 = vpop.xlane.xlu1 %2702  ;;  %v1930_v62 = vpop.permute.xlu0 %1929  ;;  %4618 = vmatpush3.bf16.msra.mxu1 %v4615_v19  ;;  %v27_v19 = vld [vmem:[%s5278_s0 + $0x10] sm:$0x3] }
 0xbd3   :  { %v2711_v52 = vsub.f32 %v5139_v33, %v2703_v22  ;;  %v2192_v7 = vadd.f32 %v2191_v36, %v1930_v62  ;;  %v2211_v36 = vpop.f32.mrb[51].mxu1 }
 0xbd5   :  { %v2726_v55 = vmul.f32 1.442695, %v2711_v52 }
 0xbd7   :  { %4730 = vpow2.f32 %v2726_v55 }
 0xbd9   :  { %v5170_v20 = vpop.eup %4726 }
 0xbda   :  { %v5172_v58 = vpop.eup %4728  ;;  %v2740_v50 = vsel %vm1037_vm5, %v5170_v20, 0.0 }
 0xbdb   :  { %v2743_v23 = vsel %vm1037_vm5, %v5172_v58, 0.0 }
 0xbdf   :  { %2741 = vadd.xlane.f32.xlu1 %v2740_v50 }
 0xbe0   :  { %2744 = vadd.xlane.f32.xlu0 %v2743_v23 }
 0xbe1   :  { %v5178_v26 = vpop.eup %4730 }
 0xbe2   :  { %v2749_v27 = vsel %vm1037_vm5, %v5178_v26, 0.0 }
 0xbe4   :  { %2750 = vadd.xlane.f32.xlu0 %v2749_v27 }
 0xbfa   :  { %1954 = vperm.xlu0 %4676, %v1817_v28   ;;  %v1820_v28 = vld [vmem:[#allocation2 + $0x3f0] sm:$0xff] }
 0xbff   :  { %v2700_v29 = vpop.xlane.xlu0 %2699 }
 0xc00   :  { %v2710_v30 = vsub.f32 %v5146_v4, %v2700_v29 }
 0xc02   :  { %v2724_v32 = vmul.f32 1.442695, %v2710_v30 }
 0xc04   :  { %4732 = vpow2.f32 %v2724_v32 }
 0xc0e   :  { %v5185_v33 = vpop.eup %4732 }
 0xc0f   :  { %v2746_v18 = vsel %vm1037_vm5, %v5185_v33, 0.0 }
 0xc10   :  { %2747 = vadd.xlane.f32.xlu1 %v2746_v18 }
 0xc21   :  { %1949 = vperm.xlu1 %4677, %v1816_v34  }
 0xc2f   :  { %v2733_v2 = vpop.xlane.xlu0 %2732 }
 0xc33   :  { %v2730_v38 = vpop.xlane.xlu1 %2729 }
 0xc34   :  { %v2739_v16 = vpop.xlane.xlu0 %2738  ;;  %4734 = vrcp.f32 %v2730_v38 }
 0xc35   :  { %4736 = vrcp.f32 %v2739_v16 }
 0xc37   :  { %v2736_v12 = vpop.xlane.xlu1 %2735 }
 0xc38   :  { %4738 = vrcp.f32 %v2736_v12 }
 0xc39   :  { %4740 = vrcp.f32 %v2733_v2 }
 0xc3b   :  { %v1935_v40 = vpop.permute.xlu1 %1934 }
 0xc3c   :  { %v2197_v4 = vadd.f32 %v5143_v35, %v1935_v40  ;;  %v1940_v43 = vpop.permute.xlu0 %1939 }
 0xc3d   :  { %v2202_v47 = vadd.f32 %v2201_v37, %v1940_v43 }
 0xc3e   :  { %v4597_v44 = vpack.c.bf16 %v2197_v4, %v2192_v7  ;;  %v4735_v15 = vpop.eup %4734 }
 0xc3f   :  { %v4737_v46 = vpop.eup %4736  ;;  %v2760_v61 = vmul.f32 %v4735_v15, %v5154_v3 }
 0xc40   :  { %v1945_v17 = vpop.permute.xlu0 %1944  ;;  %v2763_v59 = vmul.f32 %v4737_v46, %v5158_v48 }
 0xc41   :  { %v2207_v54 = vadd.f32 %v4342_v8, %v1945_v17 }
 0xc42   :  { %v4739_v13 = vpop.eup %4738 }
 0xc43   :  { %v4603_v56 = vpack.c.bf16 %v2207_v54, %v2202_v47  ;;  %v2762_v57 = vmul.f32 %v4739_v13, %v5164_v51  ;;  %v4741_v35 = vpop.eup %4740  ;;  %v3969_v47 = vld [vmem:[#allocation2 + $0x443] ss:$0 sm:$0xff]  ;;  %v3970_v13 = vld [vmem:[#allocation2 + $0x444] ss:$0 sm:$0xff] }
 0xc44   :  { %v2761_v0 = vmul.f32 %v4741_v35, %v5150_v60 }
 0xc45   :  { %4374 = vmatprep.mubr.msk.f32.mxu0 %vm1037_vm5, %v2762_v57 }
 0xc46   :  { %4375 = vmatmul.mubr.msk.f32.vlgmr.msra.gmra.mrb[20].mxu0 %vm1037_vm5, %v2763_v59 }
 0xc47   :  { %4584 = vmatpush3.bf16.xpose.msk.msra.mxu0 %vm4878_vm6, %v5108_v6  ;;  %4385 = vmatprep.mubr.msk.f32.mxu0 %vm1037_vm5, %v2760_v61 }
 0xc48   :  { %4587 = vmatprep.subr.msk.bf16.mxu0 %vm4878_vm6, %v5112_v42 }
 0xc4f   :  { %4590 = vmatpush3.bf16.xpose.msk.msra.mxu0 %vm4878_vm6, %v5112_v42 }
 0xc50   :  { %4593 = vmatprep.subr.msk.bf16.mxu0 %vm4878_vm6, %v5156_v5 }
 0xc56   :  { %4386 = vmatmul.mubr.msk.f32.vlgmr.msra.gmra.mrb[20].mxu0 %vm1037_vm5, %v2761_v0  ;;  %v1824_v0 = vld [vmem:[#allocation2 + $0x410] sm:$0xff] }
 0xc57   :  { %4596 = vmatpush3.bf16.xpose.msk.msra.mxu0 %vm4878_vm6, %v5156_v5 }
 0xc58   :  { %4599 = vmatprep.subr.msk.bf16.mxu0 %vm4878_vm6, %v4597_v44 }
 0xc5f   :  { %4602 = vmatpush3.bf16.xpose.msk.msra.mxu0 %vm4878_vm6, %v4597_v44 }
 0xc60   :  { %4605 = vmatprep.subr.msk.bf16.mxu0 %vm4878_vm6, %v4603_v56 }
 0xc6c   :  { %v2742_v6 = vpop.xlane.xlu1 %2741 }
 0xc6d   :  { %4742 = vrcp.f32 %v2742_v6  ;;  %v2745_v42 = vpop.xlane.xlu0 %2744  ;;  %v1825_v6 = vld [vmem:[#allocation2 + $0x418] sm:$0xff] }
 0xc6e   :  { %4744 = vrcp.f32 %v2745_v42 }
 0xc71   :  { %v2751_v5 = vpop.xlane.xlu0 %2750 }
 0xc77   :  { %v4743_v60 = vpop.eup %4742 }
 0xc78   :  { %v4745_v1 = vpop.eup %4744  ;;  %v2764_v3 = vmul.f32 %v4743_v60, %v5170_v20 }
 0xc79   :  { %v2765_v48 = vmul.f32 %v4745_v1, %v5172_v58  ;;  %v1955_v39 = vpop.permute.xlu0 %1954  ;;  %v4627_v1 = vpack.c.bf16 %v1825_v6, %v1824_v0  ;;  %v3977_v0 = vld [vmem:[#allocation2 + $0x445] ss:$0 sm:$0xff] }
 0xc7a   :  { %4396 = vmatprep.mubr.msk.f32.mxu0 %vm1037_vm5, %v2764_v3  ;;  %v2217_v41 = vadd.f32 %v5182_v63, %v1955_v39  ;;  %v1821_v63 = vld [vmem:[#allocation2 + $0x3f8] sm:$0xff]  ;;  %v1826_v3 = vld [vmem:[#allocation2 + $0x420] sm:$0xff] }
 0xc7b   :  { %4397 = vmatmul.mubr.msk.f32.vlgmr.msra.gmra.mrb[20].mxu0 %vm1037_vm5, %v2765_v48  ;;  %v4619_v29 = vpack.c.bf16 %v1821_v63, %v1820_v28  ;;  %v1827_v48 = vld [vmem:[#allocation2 + $0x428] sm:$0xff]  ;;  %v1829_v39 = vld [vmem:[#allocation2 + $0x438] sm:$0xff]  ;;  %v3979_v28 = vld [vmem:[#allocation2 + $0x450] ss:$0 sm:$0xff] }
 0xc7c   :  { %4608 = vmatpush3.bf16.xpose.msk.msra.mxu0 %vm4878_vm6, %v4603_v56 }
 0xc7d   :  { %4620 = vmatprep.subr.bf16.mxu1 %v4619_v29 }
 0xc7e   :  { %4622 = vmatpush3.bf16.msra.mxu1 %v4619_v29 }
 0xc9d   :  { %v2748_v49 = vpop.xlane.xlu1 %2747 }
 0xc9e   :  { %4746 = vrcp.f32 %v2748_v49  ;;  %v1828_v49 = vld [vmem:[#allocation2 + $0x430] sm:$0xff] }
 0xc9f   :  { %4748 = vrcp.f32 %v2751_v5  ;;  %v4631_v5 = vpack.c.bf16 %v1827_v48, %v1826_v3 }
 0xca1   :  { %v1950_v51 = vpop.permute.xlu1 %1949 }
 0xca2   :  { %v2212_v53 = vadd.f32 %v2211_v36, %v1950_v51  ;;  %v4635_v51 = vpack.c.bf16 %v1829_v39, %v1828_v49 }
 0xca4   :  { %v4609_v45 = vpack.c.bf16 %v2217_v41, %v2212_v53  ;;  %v4790_v41 = vmov 0.0   ;;  %v3971_v53 = vld [vmem:[#allocation2 + $0x441] ss:$0 sm:$0xff] }
 0xca6   :  { %4611 = vmatprep.subr.msk.bf16.mxu0 %vm4878_vm6, %v4609_v45 }
 0xca7   :  { %4614 = vmatpush3.bf16.xpose.msk.msra.mxu0 %vm4878_vm6, %v4609_v45 }
 0xca8   :  { %v4747_v8 = vpop.eup %4746 }
 0xca9   :  { %v4749_v37 = vpop.eup %4748  ;;  %v2766_v10 = vmul.f32 %v4747_v8, %v5185_v33 }
 0xcaa   :  { %v2767_v9 = vmul.f32 %v4749_v37, %v5178_v26 }
 0xcab   :  { %4407 = vmatprep.mubr.msk.f32.mxu0 %vm1037_vm5, %v2766_v10 }
 0xcae   :  { %4408 = vmatmul.mubr.msk.f32.vlgmr.msra.gmra.mrb[20].mxu0 %vm1037_vm5, %v2767_v9 }
 0xcaf   :  { %4480 = vmatprep.mubr.msk.f32.mxu0 %vm4791_vm8, %v4790_v41 }
 0xd81   :  { %v4409_v22 = vpop.f32.mrb[20].mxu0 }
 0xd82   :  { %v3149_v62 = vadd.f32 %v4409_v22, %v3968_v21  ;;  %v3133_v31 = vpop.f32.mrb[21].mxu0 }
 0xd83   :  { %v3148_v52 = vadd.f32 %v3968_v21, %v3133_v31  ;;  %v3974_v21 = vld [vmem:[#allocation2 + $0x442] ss:$0 sm:$0xff] }
 0xd84   :  { %v3151_v7 = vadd.f32 %v3149_v62, %v5057_v25  ;;  %v1823_v25 = vld [vmem:[#allocation2 + $0x408] sm:$0xff] }
 0xd85   :  { %v3150_v55 = vadd.f32 %v3148_v52, %v5055_v24  ;;  %v1822_v24 = vld [vmem:[#allocation2 + $0x400] sm:$0xff] }
 0xd86   :  { %v3157_v20 = vsel %vm312_vm2, %v3151_v7, 0.0  ;;  %v3153_v26 = vmul.f32 %v3151_v7, %v3151_v7  ;;  %v4623_v30 = vpack.c.bf16 %v1823_v25, %v1822_v24 }
 0xd87   :  { %3158 = vadd.xlane.f32.xlu0 %v3157_v20  ;;  %v3154_v58 = vsel %vm312_vm2, %v3150_v55, 0.0  ;;  %v3152_v50 = vmul.f32 %v3150_v55, %v3150_v55 }
 0xd88   :  { %3155 = vadd.xlane.f32.xlu1 %v3154_v58  ;;  %v3163_v27 = vsel %vm312_vm2, %v3153_v26, 0.0  ;;  %4624 = vmatprep.subr.bf16.mxu1 %v4623_v30 }
 0xd89   :  { %v3160_v23 = vsel %vm312_vm2, %v3152_v50, 0.0 }
 0xd8c   :  { %3161 = vadd.xlane.f32.xlu1 %v3160_v23 }
 0xd90   :  { %3164 = vadd.xlane.f32.xlu1 %v3163_v27 }
 0xe14   :  { %v3159_v18 = vpop.xlane.xlu0 %3158 }
 0xe15   :  { %v3156_v32 = vpop.xlane.xlu1 %3155  ;;  %v3167_v36 = vmul.f32 0.03125, %v3159_v18 }
 0xe16   :  { %v3166_v33 = vmul.f32 0.03125, %v3156_v32  ;;  %v3503_v32 = vld [vmem:[#allocation2 + $0x458] sm:$0xff] }
 0xe17   :  { %v3171_v40 = vmul.f32 %v3167_v36, %v3167_v36  ;;  %v3175_v56 = vsub.f32 %v3151_v7, %v3167_v36  ;;  %v3506_v36 = vld [vmem:[#allocation2 + $0x470] sm:$0xff] }
 0xe18   :  { %v3170_v2 = vmul.f32 %v3166_v33, %v3166_v33  ;;  %v3174_v17 = vsub.f32 %v3150_v55, %v3166_v33  ;;  %v3504_v33 = vld [vmem:[#allocation2 + $0x460] sm:$0xff] }
 0xe19   :  { %v3162_v34 = vpop.xlane.xlu1 %3161  ;;  %v4640_v18 = vpack.c.bf16 %v3504_v33, %v3503_v32 }
 0xe1a   :  { %v3168_v38 = vmul.f32 0.03125, %v3162_v34  ;;  %v3505_v34 = vld [vmem:[#allocation2 + $0x468] sm:$0xff] }
 0xe1c   :  { %v3172_v16 = vsub.f32 %v3168_v38, %v3170_v2  ;;  %v4792_v2 = vmov 0.0|0.0   ;;  %v4643_v38 = vpack.c.bf16 %v3506_v36, %v3505_v34 }
 0xe1d   :  { %v3165_v12 = vpop.xlane.xlu1 %3164  ;;  %4651 = vmatprep.subr.bf16.mxu0 %v4792_v2 }
 0xe1e   :  { %v3176_v4 = vadd.f32 1e-05, %v3172_v16  ;;  %v3169_v43 = vmul.f32 0.03125, %v3165_v12 }
 0xe20   :  { %4750 = vrsqrt.f32 %v3176_v4  ;;  %v3173_v44 = vsub.f32 %v3169_v43, %v3171_v40 }
 0xe22   :  { %v3177_v15 = vadd.f32 1e-05, %v3173_v44 }
 0xe24   :  { %4752 = vrsqrt.f32 %v3177_v15 }
 0xe2a   :  { %v4751_v46 = vpop.eup %4750 }
 0xe2b   :  { %v3180_v54 = vmul.f32 %v4751_v46, %v3174_v17 }
 0xe2d   :  { %v3186_v57 = vmul.f32 %v3969_v47, %v3180_v54 }
 0xe2e   :  { %v4753_v59 = vpop.eup %4752 }
 0xe2f   :  { %v3181_v61 = vmul.f32 %v4753_v59, %v3175_v56  ;;  %v3192_v35 = vadd.f32 %v3970_v13, %v3186_v57 }
 0xe31   :  { %v3187_v42 = vmul.f32 %v3969_v47, %v3181_v61  ;;  %4418 = vmatprep.mubr.msk.f32.mxu1 %vm312_vm2, %v3192_v35 }
 0xe33   :  { %v3193_v60 = vadd.f32 %v3970_v13, %v3187_v42 }
 0xe35   :  { %4419 = vmatmul.mubr.msk.f32.vlgmr.msra.gmra.mrb[52].mxu1 %vm312_vm2, %v3193_v60 }
 0xe36   :  { %4626 = vmatpush3.bf16.msra.mxu1 %v4623_v30  ;;  %v3507_v30 = vld [vmem:[#allocation2 + $0x478] sm:$0xff] }
 0xe37   :  { %4628 = vmatprep.subr.bf16.mxu1 %v4627_v1 }
 0xe3a   :  { %4630 = vmatpush3.bf16.msra.mxu1 %v4627_v1  ;;  %v3978_v1 = vld [vmem:[#allocation2 + $0x446] ss:$0 sm:$0xff] }
 0xe3b   :  { %4632 = vmatprep.subr.bf16.mxu1 %v4631_v5 }
 0xe3e   :  { %4634 = vmatpush3.bf16.msra.mxu1 %v4631_v5 }
 0xe3f   :  { %4636 = vmatprep.subr.bf16.mxu1 %v4635_v51 }
 0xe42   :  { %4638 = vmatpush3.bf16.msra.mxu1 %v4635_v51 }
 0xe43   :  { %4440 = vmatprep.subr.mxu1 %v4790_v41 }
 0xf08   :  { %v4420_v45 = vpop.f32.mrb[52].mxu1 }
 0xf09   :  { %v3276_v8 = vadd.f32 %v4420_v45, %v3971_v53  ;;  %v3270_v37 = vpop.f32.mrb[53].mxu1 }
 0xf0a   :  { %v3271_v10 = vadd.f32 %v3971_v53, %v3270_v37  ;;  %v3661_v37 = vld [vmem:[#allocation2 + $0x488] sm:$0xff] }
 0xf0b   :  { %v3280_v11 = vmax.f32 %v3276_v8, 0.0 }
 0xf0c   :  { %v3279_v9 = vmax.f32 %v3271_v10, 0.0  ;;  %v3662_v10 = vld [vmem:[#allocation2 + $0x490] sm:$0xff] }
 0xf0e   :  { %4437 = vmatprep.mubr.msk.f32.mxu1 %vm1644_vm7, %v3279_v9  ;;  %v4646_v9 = vpack.c.bf16 %v3662_v10, %v3661_v37 }
 0xf0f   :  { %4438 = vmatmul.mubr.msk.f32.vlgmr.msra.gmra.mrb[54].mxu1 %vm1644_vm7, %v3280_v11  ;;  %v3663_v11 = vld [vmem:[#allocation2 + $0x498] sm:$0xff] }
 0xf10   :  { %4441 = vmatpush3.msk.msra.mxu1 %vm3428_vm9, %v3418_v14  ;;  %4442 = vmatprep.mubr.msk.f32.mxu1 %vm4791_vm8, %v4790_v41  ;;  %v3664_v14 = vld [vmem:[#allocation2 + $0x4a0] sm:$0xff] }
 0xf11   :  { %4445 = vmatprep.subr.mxu1 %v4790_v41 }
 0xf13   :  { %4443 = vmatmul.mubr.msk.f32.vlgmr.msra.gmra.mrb[56].mxu1 %vm3424_vm10, %v27_v19  ;;  %v4649_v19 = vpack.c.bf16 %v3664_v14, %v3663_v11 }
 0xf14   :  { %4447 = vmatprep.mubr.msk.f32.mxu1 %vm4791_vm8, %v4790_v41  ;;  %4446 = vmatpush3.msra.mxu1 %v3507_v30 }
 0xf15   :  { %4639 = vmatprep.subr.bf16.mxu1 %v4792_v2 }
 0xfe2   :  { %v4439_v22 = vpop.f32.mrb[54].mxu1 }
 0xfe3   :  { %v3363_v62 = vadd.f32 %v4439_v22, %v3974_v21  ;;  %v3357_v31 = vpop.f32.mrb[55].mxu1  ;;  %v3984_v22 = vld [vmem:[#allocation2 + $0x480] ss:$0 sm:$0xff] }
 0xfe4   :  { %v3358_v52 = vadd.f32 %v3974_v21, %v3357_v31 }
 0xfe5   :  { %v3367_v7 = vadd.f32 %v3363_v62, %v3193_v60 }
 0xfe6   :  { %v3366_v55 = vadd.f32 %v3358_v52, %v3192_v35  ;;  %v3498_v63 = vpop.f32.mrb[56].mxu1 }
 0xfe7   :  { %v3373_v20 = vsel %vm312_vm2, %v3367_v7, 0.0  ;;  %v3369_v58 = vmul.f32 %v3367_v7, %v3367_v7  ;;  %v3499_v29 = vadd.f32 %v3979_v28, %v3498_v63  ;;  %v4444_v24 = vpop.f32.mrb[57].mxu1  ;;  %v3754_v28 = vld [vmem:[#allocation2 + $0x68] sm:$0xff] }
 0xfe8   :  { %3374 = vadd.xlane.f32.xlu1 %v3373_v20  ;;  %v3370_v50 = vsel %vm312_vm2, %v3366_v55, 0.0  ;;  %v3368_v23 = vmul.f32 %v3366_v55, %v3366_v55 }
 0xfe9   :  { %3371 = vadd.xlane.f32.xlu0 %v3370_v50  ;;  %v3379_v26 = vsel %vm312_vm2, %v3369_v58, 0.0  ;;  %v3502_v25 = vmax.f32 %v3499_v29, 0.0  ;;  %v3755_v29 = vld [vmem:[#allocation2 + $0x70] sm:$0xff] }
 0xfea   :  { %v3376_v27 = vsel %vm312_vm2, %v3368_v23, 0.0  ;;  %v4655_v24 = vpack.c.bf16 %v3755_v29, %v3754_v28 }
 0xfeb   :  { %4448 = vmatmul.mubr.msk.f32.vlgmr.msra.gmra.mrb[58].mxu1 %vm608_vm4, %v3502_v25 }
 0xfec   :  { %3380 = vadd.xlane.f32.xlu1 %v3379_v26  ;;  %4641 = vmatpush3.bf16.msra.mxu1 %v4640_v18  ;;  %v3752_v26 = vld [vmem:[#allocation2 + $0x58] sm:$0xff] }
 0xfed   :  { %3377 = vadd.xlane.f32.xlu0 %v3376_v27  ;;  %4458 = vmatprep.mubr.msk.f32.mxu1 %vm4791_vm8, %v4790_v41  ;;  %v3753_v27 = vld [vmem:[#allocation2 + $0x60] sm:$0xff] }
 0xfee   :  { %4642 = vmatprep.subr.bf16.mxu1 %v4792_v2  ;;  %v4652_v63 = vpack.c.bf16 %v3753_v27, %v3752_v26 }
 0xff0   :  { %4644 = vmatpush3.bf16.msra.mxu1 %v4643_v38  ;;  %4653 = vmatpush3.bf16.msra.mxu0 %v4652_v63 }
 0xff1   :  { %4645 = vmatprep.subr.bf16.mxu1 %v4792_v2  ;;  %4654 = vmatprep.subr.bf16.mxu0 %v4792_v2 }
 0xff4   :  { %4656 = vmatpush3.bf16.msra.mxu0 %v4655_v24 }
0x1075   :  { %v3375_v16 = vpop.xlane.xlu1 %3374 }
0x1076   :  { %v3383_v12 = vmul.f32 0.03125, %v3375_v16  ;;  %v3372_v40 = vpop.xlane.xlu0 %3371 }
0x1077   :  { %v3382_v4 = vmul.f32 0.03125, %v3372_v40 }
0x1078   :  { %v3387_v44 = vmul.f32 %v3383_v12, %v3383_v12  ;;  %v3391_v59 = vsub.f32 %v3367_v7, %v3383_v12 }
0x1079   :  { %v3381_v43 = vpop.xlane.xlu1 %3380  ;;  %v3386_v46 = vmul.f32 %v3382_v4, %v3382_v4  ;;  %v3390_v35 = vsub.f32 %v3366_v55, %v3382_v4 }
0x107a   :  { %v3385_v15 = vmul.f32 0.03125, %v3381_v43  ;;  %v3378_v17 = vpop.xlane.xlu0 %3377 }
0x107b   :  { %v3384_v47 = vmul.f32 0.03125, %v3378_v17 }
0x107c   :  { %v3389_v54 = vsub.f32 %v3385_v15, %v3387_v44 }
0x107d   :  { %v3388_v13 = vsub.f32 %v3384_v47, %v3386_v46 }
0x107e   :  { %v3393_v56 = vadd.f32 1e-05, %v3389_v54 }
0x107f   :  { %v3392_v57 = vadd.f32 1e-05, %v3388_v13 }
0x1080   :  { %4754 = vrsqrt.f32 %v3393_v56 }
0x1081   :  { %4756 = vrsqrt.f32 %v3392_v57 }
0x108a   :  { %v4755_v61 = vpop.eup %4754 }
0x108b   :  { %v4757_v6 = vpop.eup %4756  ;;  %v3397_v42 = vmul.f32 %v4755_v61, %v3391_v59 }
0x108c   :  { %v3396_v60 = vmul.f32 %v4757_v6, %v3390_v35 }
0x108d   :  { %v3403_v3 = vmul.f32 %v3977_v0, %v3397_v42 }
0x108e   :  { %v3402_v48 = vmul.f32 %v3977_v0, %v3396_v60 }
0x108f   :  { %v3409_v5 = vadd.f32 %v3978_v1, %v3403_v3 }
0x1090   :  { %v3408_v49 = vadd.f32 %v3978_v1, %v3402_v48 }
0x1091   :  { %v3414_v39 = vrot.slane %v3409_v5, 6 }
0x1092   :  { %v3411_v51 = vrot.slane %v3408_v49, 7 }
0x1094   :  { %v3417_v53 = vsel %vm3416_vm11, %v3411_v51, %v3414_v39 }
0x1095   :  { %4459 = vmatmul.mubr.msk.f32.vlgmr.msra.gmra.mrb[60].mxu1 %vm312_vm2, %v3417_v53 }
0x1096   :  { %4469 = vmatprep.mubr.msk.f32.mxu1 %vm4791_vm8, %v4790_v41  ;;  %4647 = vmatpush3.bf16.msra.mxu1 %v4646_v9  ;;  %v3985_v41 = vld [vmem:[#allocation2 + $0x4a8] ss:$0 sm:$0xff] }
0x1097   :  { %4648 = vmatprep.subr.bf16.mxu1 %v4792_v2 }
0x109a   :  { %4650 = vmatpush3.bf16.msra.mxu1 %v4649_v19 }
0x10be   :  { %v3577_v45 = vpop.f32.mrb[58].mxu1 }
0x10bf   :  { %v4449_v8 = vpop.f32.mrb[59].mxu1 }
0x1168   :  { %v3650_v21 = vpop.f32.mrb[60].mxu1 }
0x1169   :  { %v3651_v62 = vadd.f32 %v3650_v21, %v3577_v45  ;;  %v4460_v31 = vpop.f32.mrb[61].mxu1 }
0x116b   :  { %v3659_v52 = vadd.f32 %v3984_v22, %v3651_v62 }
0x116d   :  { %v3660_v7 = vmax.f32 %v3659_v52, 0.0 }
0x116f   :  { %4470 = vmatmul.mubr.msk.f32.vlgmr.msra.gmra.mrb[62].mxu1 %vm312_vm2, %v3660_v7 }
0x1242   :  { %v3739_v55 = vpop.f32.mrb[62].mxu1 }
0x1243   :  { %v3740_v20 = vadd.f32 %v3985_v41, %v3739_v55  ;;  %v4471_v58 = vpop.f32.mrb[63].mxu1 }
0x1245   :  { %v3987_v50 = vclamps-f32 %v3740_v20, 10000.0 }
0x1247   :  { %v3746_v23 = vsel %vm3745_vm12, %v3987_v50, -inf }
0x1248   :  { %3747 = vmax.xlane.f32.xlu0 %v3746_v23 }
0x12d5   :  { %v3748_v25 = vpop.xlane.xlu0 %3747 }
0x12d6   :  { %v3749_v30 = vsub.f32 %v3987_v50, %v3748_v25 }
0x12d8   :  { %v3750_v32 = vmul.f32 1.442695, %v3749_v30 }
0x12da   :  { %4758 = vpow2.f32 %v3750_v32 }
0x12e4   :  { %v4759_v33 = vpop.eup %4758 }
0x12e5   :  { %4481 = vmatmul.mubr.msk.f32.vlgmr.msra.gmra.mrb[22].mxu0 %vm312_vm2, %v4759_v33 }
0x13b8   :  { %v3825_v18 = vpop.f32.mrb[22].mxu0 }
0x13b9   :  { %4760 = vlog2.f32 %v3825_v18  ;;  %v4482_v34 = vpop.f32.mrb[23].mxu0 }
0x13c3   :  { %v4761_v36 = vpop.eup %4760 }
0x13c4   :  { %v3830_v38 = vmul.f32 0.6931472, %v4761_v36 }
0x13c6   :  { %v3831_v16 = vsub.f32 %v3749_v30, %v3830_v38 }
0x13c8   :  { %3832 = vst.msk [vmem:[%s5280_s2] sm:$0x3] %vm3745_vm12, %v3831_v16 }
0x13c9   :  { %3837 = vsyncpa [#allocation3], 1 }

</bundles_post_ra>
